<compile_context>
chip_gen: v7x
topology: tpu7x:2x2x1
jax: 0.10.0
libtpu: 0.0.40
codegen_flags: <defaults>
</compile_context>

<pallas_src>
import functools
import math

import jax
import jax.numpy as jnp
from jax.experimental import pallas as pl
from jax.experimental.pallas import tpu as pltpu

# bf16 tanh uses the EUP at ~2x the f32 rate on v6e/v7x and halves vreg pressure
# for the following score contraction.  Use jnp.float32 on v5e (no bf16 EUP/VPU).
_TANH_DTYPE = jnp.bfloat16
_MASK_BIAS = -1e30  # finite additive mask bias (avoids inf-inf NaNs on padding)


def _bahdanau_kernel(
    # query-side inputs (block index constant across kt -> DMA'd once per batch row)
    q_key_ref,      # (1, Lqp, 2H) bf16
    q_value_ref,    # (1, Lqp, 2H) bf16
    q_bias_ref,     # (1, 1, Lqp)  bf16  additive mask bias (0 valid / -1e30 masked)
    q_alpha0_ref,   # (1, 1, Lqp)  f32   previous query alphas, lane-dense
    query_ref,      # (1, 1, H)    f32
    # document-side inputs (tiled along L by the kt grid axis)
    key_ref,        # (1, TL, 2H)  bf16
    value_ref,      # (1, TL, 2H)  bf16
    bias_ref,       # (1, 1, TL)   bf16
    alpha0_ref,     # (1, 1, TL)   f32   previous document alphas, lane-dense
    # packed weights (constant block index -> fetched once)
    w_seq_ref,      # (3, 2H, 2H)  bf16  [Wq_key, Wt_key, Wt_ctx]
    vecs_ref,       # (6, 2H)      f32   [wq_alpha, q_other, wt_alpha, t_other, bq, bt]
    wqt_ref,        # (H, 4H)      f32   [Wq_query | Wt_query]
    # outputs
    ctx_ref,        # (1, 1, 2H)   f32   written on the last tile
    alphas_ref,     # (1, 1, Lp)   f32   resident across kt: raw scores, then softmax
    q_alphas_ref,   # (1, 1, Lqp)  f32   written on the first tile
    # scratch (persist across kt for a given batch row)
    tbase_ref,      # (1, 2H) f32  query projection + q_context projection row bias
    m_ref,          # (1, 1)  f32  running max
    l_ref,          # (1, 1)  f32  running sum(exp)
    acc_ref,        # (1, 2H) f32  running sum(exp * value)
):
    f32 = jnp.float32
    bf16 = jnp.bfloat16
    kt = pl.program_id(1)
    TL = key_ref.shape[1]
    H2 = key_ref.shape[2]

    wq_alpha = vecs_ref[0:1]          # (1, 2H)
    q_other = vecs_ref[1:2]
    wt_alpha = vecs_ref[2:3]
    t_other = vecs_ref[3:4]
    bq = vecs_ref[4:5]
    bt = vecs_ref[5:6]

    # -------- first tile: query-side attention, doc-side row bias, accumulator init
    @pl.when(kt == 0)
    def _():
        # folded query projections: one (1, H) @ (H, 4H) dot inside the kernel
        q_row = query_ref[0]                                            # (1, H)
        qt = jnp.dot(q_row, wqt_ref[...], preferred_element_type=f32)   # (1, 4H)
        q_proj = qt[:, :H2] + bq                                        # (1, 2H)
        t_proj = qt[:, H2:] + bt                                        # (1, 2H)

        # query-side pre-activation: one (Lqp, 2H) @ (2H, 2H) MXU matmul
        pre_q = jnp.dot(q_key_ref[0], w_seq_ref[0], preferred_element_type=f32)
        qa_col = jnp.transpose(q_alpha0_ref[0], (1, 0))                 # (Lqp, 1) XLU
        pre_q = pre_q + q_proj + qa_col * wq_alpha
        s_q = jnp.tanh(pre_q.astype(_TANH_DTYPE))                       # EUP

        # scores: VPU multiply + lane reduce, small transpose to lane-dense (1, Lqp)
        sc_q = jnp.sum(s_q.astype(f32) * q_other, axis=-1, keepdims=True)
        sc_q = jnp.transpose(sc_q, (1, 0)) + q_bias_ref[0].astype(f32)
        m_q = jnp.max(sc_q, axis=-1, keepdims=True)
        e_q = jnp.exp(sc_q - m_q)
        qa_new = e_q * (1.0 / jnp.sum(e_q, axis=-1, keepdims=True))     # (1, Lqp)
        q_alphas_ref[0] = qa_new

        # doc-side row bias: t_proj + (q_alphas @ q_value) @ Wt_ctx
        q_ctx = jnp.dot(qa_new.astype(bf16), q_value_ref[0],
                        preferred_element_type=f32)                     # (1, 2H)
        qctx_proj = jnp.dot(q_ctx.astype(bf16), w_seq_ref[2],
                            preferred_element_type=f32)                 # (1, 2H)
        tbase_ref[...] = t_proj + qctx_proj

        # flash accumulators for the document-side softmax / context
        m_ref[...] = jnp.full_like(m_ref, -jnp.inf)
        l_ref[...] = jnp.zeros_like(l_ref)
        acc_ref[...] = jnp.zeros_like(acc_ref)

    # -------- every tile: document-side scores + online softmax / context accumulate
    pre_t = jnp.dot(key_ref[0], w_seq_ref[1], preferred_element_type=f32)  # (TL, 2H)
    a_col = jnp.transpose(alpha0_ref[0], (1, 0))                            # (TL, 1)
    pre_t = pre_t + tbase_ref[...] + a_col * wt_alpha
    s_t = jnp.tanh(pre_t.astype(_TANH_DTYPE))

    sc_t = jnp.sum(s_t.astype(f32) * t_other, axis=-1, keepdims=True)
    sc_t = jnp.transpose(sc_t, (1, 0)) + bias_ref[0].astype(f32)            # (1, TL)

    # stash raw masked scores into the resident output row; normalized on last tile
    off = pl.multiple_of(kt * TL, TL)
    alphas_ref[0, :, pl.ds(off, TL)] = sc_t

    m_prev = m_ref[...]                                                     # (1, 1)
    m_new = jnp.maximum(m_prev, jnp.max(sc_t, axis=-1, keepdims=True))
    corr = jnp.exp(m_prev - m_new)
    p = jnp.exp(sc_t - m_new)                                               # (1, TL)
    l_ref[...] = corr * l_ref[...] + jnp.sum(p, axis=-1, keepdims=True)
    acc_ref[...] = corr * acc_ref[...] + jnp.dot(
        p.astype(bf16), value_ref[0], preferred_element_type=f32)           # (1, 2H)
    m_ref[...] = m_new

    # -------- last tile: finalize context and normalize stored scores to alphas
    @pl.when(kt == pl.num_programs(1) - 1)
    def _():
        inv_l = 1.0 / l_ref[...]                                            # (1, 1)
        ctx_ref[0] = acc_ref[...] * inv_l                                   # (1, 2H)
        alphas_ref[...] = jnp.exp(alphas_ref[...] - m_ref[...]) * inv_l     # (1,1,Lp)


def _round_up(x, m):
    return ((x + m - 1) // m) * m


def _pad_axis(x, axis, target):
    pad = target - x.shape[axis]
    if pad == 0:
        return x
    widths = [(0, 0)] * x.ndim
    widths[axis] = (0, pad)
    return jnp.pad(x, widths)


def _nbytes(shape, dtype):
    return math.prod(shape) * jnp.dtype(dtype).itemsize


@functools.partial(jax.jit, static_argnames=("tile_l",))
def bahdanau_attention_forward(params, query, key, value, mask,
                               q_key, q_value, q_mask, alphas, q_alphas,
                               tile_l=256):
    """Functional equivalent of BahdanauAttention.forward.

    Returns (context, alphas, q_alphas, text_loss, query_loss).  The module's
    in-place state updates (self.alphas += ..., self.q_alphas += ...) are module
    state mutation, not return values; the *previous* alphas are explicit inputs.
    """
    f32, bf16 = jnp.float32, jnp.bfloat16
    B, L, H2 = key.shape
    Lq = q_key.shape[1]
    H = query.shape[-1]
    assert H2 == 2 * H

    # ---- split the Linear weights by input segment (order of torch.cat) ----
    WqT = params["Wq"].T                      # rows: [q_key(2H) | query(H) | alpha(1)]
    wq_key, wq_query, wq_alpha = WqT[:H2], WqT[H2:H2 + H], WqT[H2 + H:H2 + H + 1]
    WtT = params["Wt"].T                      # [key(2H) | query(H) | alpha(1) | q_ctx(2H)]
    wt_key, wt_query, wt_alpha = WtT[:H2], WtT[H2:H2 + H], WtT[H2 + H:H2 + H + 1]
    wt_ctx = WtT[H2 + H + 1:]

    # packed weights (cuts the DMA descriptor / input count)
    w_seq = jnp.stack([wq_key, wt_key, wt_ctx]).astype(bf16)            # (3, 2H, 2H)
    vecs = jnp.concatenate(
        [wq_alpha, params["query_other"], wt_alpha, params["text_other"],
         params["bq"][None, :], params["bt"][None, :]], axis=0).astype(f32)  # (6, 2H)
    wqt = jnp.concatenate([wq_query, wt_query], axis=1).astype(f32)     # (H, 4H)

    # ---- pad sequence axes: lane-dense (multiple-of-128) tiles, masked tails ----
    tile = max(128, _round_up(tile_l, 128))
    TL = min(tile, _round_up(L, 128))
    Lp = _round_up(L, TL)
    KT = Lp // TL
    Lqp = _round_up(Lq, 128)
    # TODO(synk): if Lq ever grows to thousands, tile the query side like the doc side.

    key_b = _pad_axis(key, 1, Lp).astype(bf16)
    value_b = _pad_axis(value, 1, Lp).astype(bf16)
    q_key_b = _pad_axis(q_key, 1, Lqp).astype(bf16)
    q_value_b = _pad_axis(q_value, 1, Lqp).astype(bf16)

    # additive mask biases (replace in-kernel compare+select with a single add)
    bias = jnp.where(_pad_axis(mask, 2, Lp) != 0, 0.0, _MASK_BIAS).astype(bf16)
    q_bias = jnp.where(_pad_axis(q_mask, 2, Lqp) != 0, 0.0, _MASK_BIAS).astype(bf16)

    # previous alphas stay lane-dense (B, 1, L); (L, 1) expansion happens in-kernel
    alphas0 = _pad_axis(alphas, 2, Lp).astype(f32)
    q_alphas0 = _pad_axis(q_alphas, 2, Lqp).astype(f32)
    query_f = query.astype(f32)

    inputs = [q_key_b, q_value_b, q_bias, q_alphas0, query_f,
              key_b, value_b, bias, alphas0,
              w_seq, vecs, wqt]

    in_specs = [
        pl.BlockSpec((1, Lqp, H2), lambda b, kt: (b, 0, 0)),
        pl.BlockSpec((1, Lqp, H2), lambda b, kt: (b, 0, 0)),
        pl.BlockSpec((1, 1, Lqp), lambda b, kt: (b, 0, 0)),
        pl.BlockSpec((1, 1, Lqp), lambda b, kt: (b, 0, 0)),
        pl.BlockSpec((1, 1, H), lambda b, kt: (b, 0, 0)),
        pl.BlockSpec((1, TL, H2), lambda b, kt: (b, kt, 0)),
        pl.BlockSpec((1, TL, H2), lambda b, kt: (b, kt, 0)),
        pl.BlockSpec((1, 1, TL), lambda b, kt: (b, 0, kt)),
        pl.BlockSpec((1, 1, TL), lambda b, kt: (b, 0, kt)),
        pl.BlockSpec((3, H2, H2), lambda b, kt: (0, 0, 0)),
        pl.BlockSpec((6, H2), lambda b, kt: (0, 0)),
        pl.BlockSpec((H, 4 * H), lambda b, kt: (0, 0)),
    ]
    out_shape = [
        jax.ShapeDtypeStruct((B, 1, H2), f32),      # context
        jax.ShapeDtypeStruct((B, 1, Lp), f32),      # new document alphas (lane-dense)
        jax.ShapeDtypeStruct((B, 1, Lqp), f32),     # new query alphas (lane-dense)
    ]
    out_specs = [
        pl.BlockSpec((1, 1, H2), lambda b, kt: (b, 0, 0)),
        pl.BlockSpec((1, 1, Lp), lambda b, kt: (b, 0, 0)),   # resident across kt
        pl.BlockSpec((1, 1, Lqp), lambda b, kt: (b, 0, 0)),
    ]
    scratch_shapes = [
        pltpu.VMEM((1, H2), f32),   # tbase
        pltpu.VMEM((1, 1), f32),    # running max
        pltpu.VMEM((1, 1), f32),    # running sum(exp)
        pltpu.VMEM((1, H2), f32),   # running context accumulator
    ]

    # explicit VMEM budget (scoped defaults 16/32 MiB are far below physical)
    block_bytes = (
        2 * _nbytes((1, Lqp, H2), bf16) + _nbytes((1, 1, Lqp), bf16)
        + _nbytes((1, 1, Lqp), f32) + _nbytes((1, 1, H), f32)
        + 2 * _nbytes((1, TL, H2), bf16) + _nbytes((1, 1, TL), bf16)
        + _nbytes((1, 1, TL), f32)
        + _nbytes((3, H2, H2), bf16) + _nbytes((6, H2), f32) + _nbytes((H, 4 * H), f32)
        + _nbytes((1, 1, H2), f32) + _nbytes((1, 1, Lp), f32) + _nbytes((1, 1, Lqp), f32))
    vmem_limit = int(min(max(8 * block_bytes, 16 * 2 ** 20), 64 * 2 ** 20))

    context, alphas_p, q_alphas_p = pl.pallas_call(
        _bahdanau_kernel,
        out_shape=out_shape,
        grid=(B, KT),
        in_specs=in_specs,
        out_specs=out_specs,
        scratch_shapes=scratch_shapes,
        compiler_params=pltpu.CompilerParams(
            dimension_semantics=("parallel", "arbitrary"),
            vmem_limit_bytes=vmem_limit),
    )(*inputs)

    alphas_new = alphas_p[:, :, :L]                  # (B, 1, L)
    q_alphas_new = q_alphas_p[:, :, :Lq]             # (B, 1, Lq)

    # tiny cross-batch loss reductions: plain JAX, fused under this jit
    query_loss = jnp.sum(jnp.min(
        jnp.concatenate([q_alphas[:, 0, :], q_alphas_new[:, 0, :]], axis=0), axis=0))
    text_loss = jnp.sum(jnp.min(
        jnp.concatenate([alphas[:, 0, :], alphas_new[:, 0, :]], axis=0), axis=0))

    return context, alphas_new, q_alphas_new, text_loss, query_loss


def _reference_forward(params, query, key, value, mask,
                       q_key, q_value, q_mask, alphas, q_alphas):
    """Pure-JAX float32 reference mirroring the PyTorch forward exactly."""
    Wq, bq, Wt, bt = params["Wq"], params["bq"], params["Wt"], params["bt"]
    q_other, t_other = params["query_other"], params["text_other"]
    B, L, H2 = key.shape
    Lq = q_key.shape[1]
    H = query.shape[-1]

    query_rep_q = jnp.broadcast_to(query, (B, Lq, H))
    feat_q = jnp.concatenate(
        [q_key, query_rep_q, jnp.reshape(q_alphas, (B, Lq, 1))], axis=-1)
    s_q = jnp.tanh(feat_q @ Wq.T + bq)
    scores_q = jnp.einsum('bld,d->bl', s_q, q_other[0])[:, None, :]
    scores_q = jnp.where(q_mask == 0, -jnp.inf, scores_q)
    q_alphas_new = jax.nn.softmax(scores_q, axis=-1)
    query_loss = jnp.sum(jnp.min(
        jnp.concatenate([q_alphas[:, 0, :], q_alphas_new[:, 0, :]], axis=0), axis=0))
    q_context = q_alphas_new @ q_value                   # (B, 1, 2H)

    query_rep_t = jnp.broadcast_to(query, (B, L, H))
    q_ctx_rep = jnp.broadcast_to(q_context, (B, L, H2))
    feat_t = jnp.concatenate(
        [key, query_rep_t, jnp.reshape(alphas, (B, L, 1)), q_ctx_rep], axis=-1)
    s_t = jnp.tanh(feat_t @ Wt.T + bt)
    scores_t = jnp.einsum('bld,d->bl', s_t, t_other[0])[:, None, :]
    scores_t = jnp.where(mask == 0, -jnp.inf, scores_t)
    alphas_new = jax.nn.softmax(scores_t, axis=-1)
    text_loss = jnp.sum(jnp.min(
        jnp.concatenate([alphas[:, 0, :], alphas_new[:, 0, :]], axis=0), axis=0))
    context = alphas_new @ value
    return context, alphas_new, q_alphas_new, text_loss, query_loss


if __name__ == "__main__":
    def run_case(case_idx, B, H, L, Lq, tile_l):
        H2 = 2 * H
        root = jax.random.fold_in(jax.random.PRNGKey(0), case_idx)
        ks = jax.random.split(root, 13)

        # Deterministic synthetic parameter init (shapes from the module __init__).
        bound_q = 1.0 / float(jnp.sqrt(jnp.float32(3 * H + 1)))
        bound_t = 1.0 / float(jnp.sqrt(jnp.float32(5 * H + 1)))
        params = {
            "Wq": jax.random.uniform(ks[0], (H2, 3 * H + 1), jnp.float32, -bound_q, bound_q),
            "bq": jax.random.uniform(ks[1], (H2,), jnp.float32, -bound_q, bound_q),
            "Wt": jax.random.uniform(ks[2], (H2, 5 * H + 1), jnp.float32, -bound_t, bound_t),
            "bt": jax.random.uniform(ks[3], (H2,), jnp.float32, -bound_t, bound_t),
            "query_other": jax.random.uniform(ks[4], (1, H2), jnp.float32, -0.005, 0.005),
            "text_other": jax.random.uniform(ks[5], (1, H2), jnp.float32, -0.005, 0.005),
        }
        # TODO(synk): self.ctx2ctx is defined in __init__ but never used in forward; omitted.

        query = jax.random.normal(ks[6], (B, 1, H), jnp.float32)
        key = jax.random.normal(ks[7], (B, L, H2), jnp.float32)
        value = jax.random.normal(ks[8], (B, L, H2), jnp.float32)
        q_key = jax.random.normal(ks[9], (B, Lq, H2), jnp.float32)
        q_value = jax.random.normal(ks[10], (B, Lq, H2), jnp.float32)

        doc_lens = jnp.array([L, max(1, L - 4)])[:B]
        q_lens = jnp.array([Lq, max(1, Lq - 3)])[:B]
        mask = (jnp.arange(L)[None, None, :] < doc_lens[:, None, None]).astype(jnp.float32)
        q_mask = (jnp.arange(Lq)[None, None, :] < q_lens[:, None, None]).astype(jnp.float32)

        a0 = jax.random.uniform(ks[11], (B, 1, L), jnp.float32, 0.01, 1.0)
        alphas_state = a0 / jnp.sum(a0, axis=-1, keepdims=True)
        a1 = jax.random.uniform(ks[12], (B, 1, Lq), jnp.float32, 0.01, 1.0)
        q_alphas_state = a1 / jnp.sum(a1, axis=-1, keepdims=True)

        outs = bahdanau_attention_forward(
            params, query, key, value, mask,
            q_key, q_value, q_mask, alphas_state, q_alphas_state, tile_l=tile_l)
        outs = jax.block_until_ready(outs)

        refs = _reference_forward(
            params, query, key, value, mask,
            q_key, q_value, q_mask, alphas_state, q_alphas_state)

        # Kernel uses bf16 operands / bf16 tanh with f32 accumulation: compare against
        # the exact f32 reference with a bf16-appropriate tolerance.
        names = ["context", "alphas", "q_alphas", "text_loss", "query_loss"]
        for name, o, r in zip(names, outs, refs):
            assert jnp.allclose(o, r, atol=3e-2, rtol=5e-2), (case_idx, name, o, r)

    # small shapes consistent with the module
    run_case(0, B=2, H=32, L=16, Lq=8, tile_l=256)     # single-tile (KT=1) path
    run_case(1, B=2, H=32, L=300, Lq=11, tile_l=128)   # multi-tile (KT=3) flash path
    print("KERNEL_OK")
</pallas_src>

<mosaic_0001>
module attributes {stable_mosaic.version = 11 : i64} {
  func.func @_bahdanau_kernel(%arg0: i32, %arg1: i32, %arg2: memref<1x128x64xbf16, #tpu.memory_space<vmem>>, %arg3: memref<1x128x64xbf16, #tpu.memory_space<vmem>>, %arg4: memref<1x1x128xbf16, #tpu.memory_space<vmem>>, %arg5: memref<1x1x128xf32, #tpu.memory_space<vmem>>, %arg6: memref<1x1x32xf32, #tpu.memory_space<vmem>>, %arg7: memref<1x128x64xbf16, #tpu.memory_space<vmem>>, %arg8: memref<1x128x64xbf16, #tpu.memory_space<vmem>>, %arg9: memref<1x1x128xbf16, #tpu.memory_space<vmem>>, %arg10: memref<1x1x128xf32, #tpu.memory_space<vmem>>, %arg11: memref<3x64x64xbf16, #tpu.memory_space<vmem>>, %arg12: memref<6x64xf32, #tpu.memory_space<vmem>>, %arg13: memref<32x128xf32, #tpu.memory_space<vmem>>, %arg14: memref<1x1x64xf32, #tpu.memory_space<vmem>>, %arg15: memref<1x1x128xf32, #tpu.memory_space<vmem>>, %arg16: memref<1x1x128xf32, #tpu.memory_space<vmem>>, %arg17: memref<1x64xf32, #tpu.memory_space<vmem>>, %arg18: memref<1x1xf32, #tpu.memory_space<vmem>>, %arg19: memref<1x1xf32, #tpu.memory_space<vmem>>, %arg20: memref<1x64xf32, #tpu.memory_space<vmem>>) attributes {dimension_semantics = [#tpu.dimension_semantics<parallel>, #tpu.dimension_semantics<arbitrary>], iteration_bounds = array<i64: 2, 1>, scalar_prefetch = 0 : i64, scratch_operands = 4 : i64, tpu.core_type = #tpu.core_type<tc>, window_params = [{transform_indices = @transform_0, window_bounds = array<i64: 1, 128, 64>}, {transform_indices = @transform_1, window_bounds = array<i64: 1, 128, 64>}, {transform_indices = @transform_2, window_bounds = array<i64: 1, 1, 128>}, {transform_indices = @transform_3, window_bounds = array<i64: 1, 1, 128>}, {transform_indices = @transform_4, window_bounds = array<i64: 1, 1, 32>}, {transform_indices = @transform_5, window_bounds = array<i64: 1, 128, 64>}, {transform_indices = @transform_6, window_bounds = array<i64: 1, 128, 64>}, {transform_indices = @transform_7, window_bounds = array<i64: 1, 1, 128>}, {transform_indices = @transform_8, window_bounds = array<i64: 1, 1, 128>}, {pipeline_mode = #tpu.pipeline_mode<synchronous>, transform_indices = @transform_9, window_bounds = array<i64: 3, 64, 64>}, {pipeline_mode = #tpu.pipeline_mode<synchronous>, transform_indices = @transform_10, window_bounds = array<i64: 6, 64>}, {pipeline_mode = #tpu.pipeline_mode<synchronous>, transform_indices = @transform_11, window_bounds = array<i64: 32, 128>}, {transform_indices = @transform_12, window_bounds = array<i64: 1, 1, 64>}, {transform_indices = @transform_13, window_bounds = array<i64: 1, 1, 128>}, {transform_indices = @transform_14, window_bounds = array<i64: 1, 1, 128>}]} {
    %c0 = arith.constant 0 : index
    %c0_0 = arith.constant 0 : index
    %0 = vector.load %arg12[%c0, %c0_0] : memref<6x64xf32, #tpu.memory_space<vmem>>, vector<1x64xf32>
    %c1 = arith.constant 1 : index
    %c0_1 = arith.constant 0 : index
    %1 = vector.load %arg12[%c1, %c0_1] : memref<6x64xf32, #tpu.memory_space<vmem>>, vector<1x64xf32>
    %c2 = arith.constant 2 : index
    %c0_2 = arith.constant 0 : index
    %2 = vector.load %arg12[%c2, %c0_2] : memref<6x64xf32, #tpu.memory_space<vmem>>, vector<1x64xf32>
    %c3 = arith.constant 3 : index
    %c0_3 = arith.constant 0 : index
    %3 = vector.load %arg12[%c3, %c0_3] : memref<6x64xf32, #tpu.memory_space<vmem>>, vector<1x64xf32>
    %c4 = arith.constant 4 : index
    %c0_4 = arith.constant 0 : index
    %4 = vector.load %arg12[%c4, %c0_4] : memref<6x64xf32, #tpu.memory_space<vmem>>, vector<1x64xf32>
    %c5 = arith.constant 5 : index
    %c0_5 = arith.constant 0 : index
    %5 = vector.load %arg12[%c5, %c0_5] : memref<6x64xf32, #tpu.memory_space<vmem>>, vector<1x64xf32>
    %c0_i32 = arith.constant 0 : i32
    %6 = arith.cmpi eq, %arg1, %c0_i32 : i32
    %7 = arith.extui %6 : i1 to i32
    %c0_i32_6 = arith.constant 0 : i32
    %8 = arith.cmpi ne, %7, %c0_i32_6 : i32
    scf.if %8 {
      %c0_44 = arith.constant 0 : index
      %c0_45 = arith.constant 0 : index
      %c0_46 = arith.constant 0 : index
      %70 = vector.load %arg6[%c0_44, %c0_45, %c0_46] : memref<1x1x32xf32, #tpu.memory_space<vmem>>, vector<1x1x32xf32>
      %71 = vector.shape_cast %70 : vector<1x1x32xf32> to vector<1x32xf32>
      %c0_47 = arith.constant 0 : index
      %c0_48 = arith.constant 0 : index
      %72 = vector.load %arg13[%c0_47, %c0_48] : memref<32x128xf32, #tpu.memory_space<vmem>>, vector<32x128xf32>
      %cst_49 = arith.constant dense<0.000000e+00> : vector<1x128xf32>
      %73 = tpu.matmul %71, %72, %cst_49 {dimension_numbers = #tpu.dot_dimension_numbers<[1], [0], [0], [1], [0, 0, 1, 1], [], []>} : vector<1x32xf32>, vector<32x128xf32>, vector<1x128xf32> -> vector<1x128xf32>
      %74 = vector.extract_strided_slice %73 {offsets = [0, 0], sizes = [1, 64], strides = [1, 1]} : vector<1x128xf32> to vector<1x64xf32>
      %75 = arith.addf %74, %4 : vector<1x64xf32>
      %76 = vector.extract_strided_slice %73 {offsets = [0, 64], sizes = [1, 64], strides = [1, 1]} : vector<1x128xf32> to vector<1x64xf32>
      %77 = arith.addf %76, %5 : vector<1x64xf32>
      %c0_50 = arith.constant 0 : index
      %c0_51 = arith.constant 0 : index
      %c0_52 = arith.constant 0 : index
      %78 = vector.load %arg2[%c0_50, %c0_51, %c0_52] : memref<1x128x64xbf16, #tpu.memory_space<vmem>>, vector<1x128x64xbf16>
      %79 = vector.shape_cast %78 : vector<1x128x64xbf16> to vector<128x64xbf16>
      %c0_53 = arith.constant 0 : index
      %c0_54 = arith.constant 0 : index
      %c0_55 = arith.constant 0 : index
      %80 = vector.load %arg11[%c0_53, %c0_54, %c0_55] : memref<3x64x64xbf16, #tpu.memory_space<vmem>>, vector<1x64x64xbf16>
      %81 = vector.shape_cast %80 : vector<1x64x64xbf16> to vector<64x64xbf16>
      %cst_56 = arith.constant dense<0.000000e+00> : vector<128x64xf32>
      %82 = tpu.matmul %79, %81, %cst_56 {dimension_numbers = #tpu.dot_dimension_numbers<[1], [0], [0], [1], [0, 0, 1, 1], [], []>} : vector<128x64xbf16>, vector<64x64xbf16>, vector<128x64xf32> -> vector<128x64xf32>
      %c0_57 = arith.constant 0 : index
      %c0_58 = arith.constant 0 : index
      %c0_59 = arith.constant 0 : index
      %83 = vector.load %arg5[%c0_57, %c0_58, %c0_59] : memref<1x1x128xf32, #tpu.memory_space<vmem>>, vector<1x1x128xf32>
      %84 = vector.shape_cast %83 : vector<1x1x128xf32> to vector<1x128xf32>
      %85 = tpu.transpose %84, [1, 0] : vector<1x128xf32> -> vector<128x1xf32>
      %86 = vector.broadcast %75 : vector<1x64xf32> to vector<128x64xf32>
      %87 = arith.addf %82, %86 : vector<128x64xf32>
      %88 = vector.broadcast %85 : vector<128x1xf32> to vector<128x64xf32>
      %89 = vector.broadcast %0 : vector<1x64xf32> to vector<128x64xf32>
      %90 = arith.mulf %88, %89 : vector<128x64xf32>
      %91 = arith.addf %87, %90 : vector<128x64xf32>
      %92 = arith.truncf %91 : vector<128x64xf32> to vector<128x64xbf16>
      %93 = math.tanh %92 : vector<128x64xbf16>
      %94 = arith.extf %93 : vector<128x64xbf16> to vector<128x64xf32>
      %95 = vector.broadcast %1 : vector<1x64xf32> to vector<128x64xf32>
      %96 = arith.mulf %94, %95 : vector<128x64xf32>
      %cst_60 = arith.constant dense<0.000000e+00> : vector<128xf32>
      %97 = vector.multi_reduction <add>, %96, %cst_60 [1] : vector<128x64xf32> to vector<128xf32>
      %98 = vector.shape_cast %97 : vector<128xf32> to vector<128x1xf32>
      %99 = tpu.transpose %98, [1, 0] : vector<128x1xf32> -> vector<1x128xf32>
      %c0_61 = arith.constant 0 : index
      %c0_62 = arith.constant 0 : index
      %c0_63 = arith.constant 0 : index
      %100 = vector.load %arg4[%c0_61, %c0_62, %c0_63] : memref<1x1x128xbf16, #tpu.memory_space<vmem>>, vector<1x1x128xbf16>
      %101 = vector.shape_cast %100 : vector<1x1x128xbf16> to vector<1x128xbf16>
      %102 = arith.extf %101 : vector<1x128xbf16> to vector<1x128xf32>
      %103 = arith.addf %99, %102 : vector<1x128xf32>
      %cst_64 = arith.constant dense<0xFF800000> : vector<1xf32>
      %104 = vector.multi_reduction <maximumf>, %103, %cst_64 [1] : vector<1x128xf32> to vector<1xf32>
      %105 = vector.shape_cast %104 : vector<1xf32> to vector<1x1xf32>
      %106 = vector.broadcast %105 : vector<1x1xf32> to vector<1x128xf32>
      %107 = arith.subf %103, %106 : vector<1x128xf32>
      %108 = math.exp %107 : vector<1x128xf32>
      %cst_65 = arith.constant dense<0.000000e+00> : vector<1xf32>
      %109 = vector.multi_reduction <add>, %108, %cst_65 [1] : vector<1x128xf32> to vector<1xf32>
      %110 = vector.shape_cast %109 : vector<1xf32> to vector<1x1xf32>
      %cst_66 = arith.constant 1.000000e+00 : f32
      %111 = vector.broadcast %cst_66 : f32 to vector<1x1xf32>
      %112 = arith.divf %111, %110 : vector<1x1xf32>
      %113 = vector.broadcast %112 : vector<1x1xf32> to vector<1x128xf32>
      %114 = arith.mulf %108, %113 : vector<1x128xf32>
      %c0_67 = arith.constant 0 : index
      %c0_68 = arith.constant 0 : index
      %c0_69 = arith.constant 0 : index
      %115 = vector.load %arg16[%c0_67, %c0_68, %c0_69] : memref<1x1x128xf32, #tpu.memory_space<vmem>>, vector<1x1x128xf32>
      %116 = vector.shape_cast %115 : vector<1x1x128xf32> to vector<1x128xf32>
      %117 = vector.shape_cast %114 : vector<1x128xf32> to vector<1x1x128xf32>
      tpu.vector_store %arg16[%c0_67, %c0_68, %c0_69], %117 {strides = array<i32>} : memref<1x1x128xf32, #tpu.memory_space<vmem>>, vector<1x1x128xf32>,
      %118 = arith.truncf %114 : vector<1x128xf32> to vector<1x128xbf16>
      %c0_70 = arith.constant 0 : index
      %c0_71 = arith.constant 0 : index
      %c0_72 = arith.constant 0 : index
      %119 = vector.load %arg3[%c0_70, %c0_71, %c0_72] : memref<1x128x64xbf16, #tpu.memory_space<vmem>>, vector<1x128x64xbf16>
      %120 = vector.shape_cast %119 : vector<1x128x64xbf16> to vector<128x64xbf16>
      %cst_73 = arith.constant dense<0.000000e+00> : vector<1x64xf32>
      %121 = tpu.matmul %118, %120, %cst_73 {dimension_numbers = #tpu.dot_dimension_numbers<[1], [0], [0], [1], [0, 0, 1, 1], [], []>} : vector<1x128xbf16>, vector<128x64xbf16>, vector<1x64xf32> -> vector<1x64xf32>
      %122 = arith.truncf %121 : vector<1x64xf32> to vector<1x64xbf16>
      %c2_74 = arith.constant 2 : index
      %c0_75 = arith.constant 0 : index
      %c0_76 = arith.constant 0 : index
      %123 = vector.load %arg11[%c2_74, %c0_75, %c0_76] : memref<3x64x64xbf16, #tpu.memory_space<vmem>>, vector<1x64x64xbf16>
      %124 = vector.shape_cast %123 : vector<1x64x64xbf16> to vector<64x64xbf16>
      %cst_77 = arith.constant dense<0.000000e+00> : vector<1x64xf32>
      %125 = tpu.matmul %122, %124, %cst_77 {dimension_numbers = #tpu.dot_dimension_numbers<[1], [0], [0], [1], [0, 0, 1, 1], [], []>} : vector<1x64xbf16>, vector<64x64xbf16>, vector<1x64xf32> -> vector<1x64xf32>
      %126 = arith.addf %77, %125 : vector<1x64xf32>
      %c0_78 = arith.constant 0 : index
      %c0_79 = arith.constant 0 : index
      %127 = vector.load %arg17[%c0_78, %c0_79] : memref<1x64xf32, #tpu.memory_space<vmem>>, vector<1x64xf32>
      tpu.vector_store %arg17[%c0_78, %c0_79], %126 {strides = array<i32>} : memref<1x64xf32, #tpu.memory_space<vmem>>, vector<1x64xf32>,
      %cst_80 = arith.constant 0xFF800000 : f32
      %128 = vector.broadcast %cst_80 : f32 to vector<1x1xf32>
      %c0_81 = arith.constant 0 : index
      %c0_82 = arith.constant 0 : index
      %129 = vector.load %arg18[%c0_81, %c0_82] : memref<1x1xf32, #tpu.memory_space<vmem>>, vector<1x1xf32>
      tpu.vector_store %arg18[%c0_81, %c0_82], %128 {strides = array<i32>} : memref<1x1xf32, #tpu.memory_space<vmem>>, vector<1x1xf32>,
      %cst_83 = arith.constant 0.000000e+00 : f32
      %130 = vector.broadcast %cst_83 : f32 to vector<1x1xf32>
      %c0_84 = arith.constant 0 : index
      %c0_85 = arith.constant 0 : index
      %131 = vector.load %arg19[%c0_84, %c0_85] : memref<1x1xf32, #tpu.memory_space<vmem>>, vector<1x1xf32>
      tpu.vector_store %arg19[%c0_84, %c0_85], %130 {strides = array<i32>} : memref<1x1xf32, #tpu.memory_space<vmem>>, vector<1x1xf32>,
      %cst_86 = arith.constant 0.000000e+00 : f32
      %132 = vector.broadcast %cst_86 : f32 to vector<1x64xf32>
      %c0_87 = arith.constant 0 : index
      %c0_88 = arith.constant 0 : index
      %133 = vector.load %arg20[%c0_87, %c0_88] : memref<1x64xf32, #tpu.memory_space<vmem>>, vector<1x64xf32>
      tpu.vector_store %arg20[%c0_87, %c0_88], %132 {strides = array<i32>} : memref<1x64xf32, #tpu.memory_space<vmem>>, vector<1x64xf32>,
    } else {
    }
    %c0_7 = arith.constant 0 : index
    %c0_8 = arith.constant 0 : index
    %c0_9 = arith.constant 0 : index
    %9 = vector.load %arg7[%c0_7, %c0_8, %c0_9] : memref<1x128x64xbf16, #tpu.memory_space<vmem>>, vector<1x128x64xbf16>
    %10 = vector.shape_cast %9 : vector<1x128x64xbf16> to vector<128x64xbf16>
    %c1_10 = arith.constant 1 : index
    %c0_11 = arith.constant 0 : index
    %c0_12 = arith.constant 0 : index
    %11 = vector.load %arg11[%c1_10, %c0_11, %c0_12] : memref<3x64x64xbf16, #tpu.memory_space<vmem>>, vector<1x64x64xbf16>
    %12 = vector.shape_cast %11 : vector<1x64x64xbf16> to vector<64x64xbf16>
    %cst = arith.constant dense<0.000000e+00> : vector<128x64xf32>
    %13 = tpu.matmul %10, %12, %cst {dimension_numbers = #tpu.dot_dimension_numbers<[1], [0], [0], [1], [0, 0, 1, 1], [], []>} : vector<128x64xbf16>, vector<64x64xbf16>, vector<128x64xf32> -> vector<128x64xf32>
    %c0_13 = arith.constant 0 : index
    %c0_14 = arith.constant 0 : index
    %c0_15 = arith.constant 0 : index
    %14 = vector.load %arg10[%c0_13, %c0_14, %c0_15] : memref<1x1x128xf32, #tpu.memory_space<vmem>>, vector<1x1x128xf32>
    %15 = vector.shape_cast %14 : vector<1x1x128xf32> to vector<1x128xf32>
    %16 = tpu.transpose %15, [1, 0] : vector<1x128xf32> -> vector<128x1xf32>
    %c0_16 = arith.constant 0 : index
    %c0_17 = arith.constant 0 : index
    %17 = vector.load %arg17[%c0_16, %c0_17] : memref<1x64xf32, #tpu.memory_space<vmem>>, vector<1x64xf32>
    %18 = vector.broadcast %17 : vector<1x64xf32> to vector<128x64xf32>
    %19 = arith.addf %13, %18 : vector<128x64xf32>
    %20 = vector.broadcast %16 : vector<128x1xf32> to vector<128x64xf32>
    %21 = vector.broadcast %2 : vector<1x64xf32> to vector<128x64xf32>
    %22 = arith.mulf %20, %21 : vector<128x64xf32>
    %23 = arith.addf %19, %22 : vector<128x64xf32>
    %24 = arith.truncf %23 : vector<128x64xf32> to vector<128x64xbf16>
    %25 = math.tanh %24 : vector<128x64xbf16>
    %26 = arith.extf %25 : vector<128x64xbf16> to vector<128x64xf32>
    %27 = vector.broadcast %3 : vector<1x64xf32> to vector<128x64xf32>
    %28 = arith.mulf %26, %27 : vector<128x64xf32>
    %cst_18 = arith.constant dense<0.000000e+00> : vector<128xf32>
    %29 = vector.multi_reduction <add>, %28, %cst_18 [1] : vector<128x64xf32> to vector<128xf32>
    %30 = vector.shape_cast %29 : vector<128xf32> to vector<128x1xf32>
    %31 = tpu.transpose %30, [1, 0] : vector<128x1xf32> -> vector<1x128xf32>
    %c0_19 = arith.constant 0 : index
    %c0_20 = arith.constant 0 : index
    %c0_21 = arith.constant 0 : index
    %32 = vector.load %arg9[%c0_19, %c0_20, %c0_21] : memref<1x1x128xbf16, #tpu.memory_space<vmem>>, vector<1x1x128xbf16>
    %33 = vector.shape_cast %32 : vector<1x1x128xbf16> to vector<1x128xbf16>
    %34 = arith.extf %33 : vector<1x128xbf16> to vector<1x128xf32>
    %35 = arith.addf %31, %34 : vector<1x128xf32>
    %c128_i32 = arith.constant 128 : i32
    %36 = arith.muli %arg1, %c128_i32 : i32
    %37 = tpu.assume_multiple %36, 128 : i32
    %c0_22 = arith.constant 0 : index
    %c0_23 = arith.constant 0 : index
    %38 = arith.index_cast %37 : i32 to index
    %39 = vector.load %arg15[%c0_22, %c0_23, %38] : memref<1x1x128xf32, #tpu.memory_space<vmem>>, vector<1x1x128xf32>
    %40 = vector.shape_cast %39 : vector<1x1x128xf32> to vector<1x128xf32>
    %41 = vector.shape_cast %35 : vector<1x128xf32> to vector<1x1x128xf32>
    tpu.vector_store %arg15[%c0_22, %c0_23, %38], %41 {strides = array<i32>} : memref<1x1x128xf32, #tpu.memory_space<vmem>>, vector<1x1x128xf32>,
    %c0_24 = arith.constant 0 : index
    %c0_25 = arith.constant 0 : index
    %42 = vector.load %arg18[%c0_24, %c0_25] : memref<1x1xf32, #tpu.memory_space<vmem>>, vector<1x1xf32>
    %cst_26 = arith.constant dense<0xFF800000> : vector<1xf32>
    %43 = vector.multi_reduction <maximumf>, %35, %cst_26 [1] : vector<1x128xf32> to vector<1xf32>
    %44 = vector.shape_cast %43 : vector<1xf32> to vector<1x1xf32>
    %45 = arith.maximumf %42, %44 : vector<1x1xf32>
    %46 = arith.subf %42, %45 : vector<1x1xf32>
    %47 = math.exp %46 : vector<1x1xf32>
    %48 = vector.broadcast %45 : vector<1x1xf32> to vector<1x128xf32>
    %49 = arith.subf %35, %48 : vector<1x128xf32>
    %50 = math.exp %49 : vector<1x128xf32>
    %c0_27 = arith.constant 0 : index
    %c0_28 = arith.constant 0 : index
    %51 = vector.load %arg19[%c0_27, %c0_28] : memref<1x1xf32, #tpu.memory_space<vmem>>, vector<1x1xf32>
    %52 = arith.mulf %47, %51 : vector<1x1xf32>
    %cst_29 = arith.constant dense<0.000000e+00> : vector<1xf32>
    %53 = vector.multi_reduction <add>, %50, %cst_29 [1] : vector<1x128xf32> to vector<1xf32>
    %54 = vector.shape_cast %53 : vector<1xf32> to vector<1x1xf32>
    %55 = arith.addf %52, %54 : vector<1x1xf32>
    %c0_30 = arith.constant 0 : index
    %c0_31 = arith.constant 0 : index
    %56 = vector.load %arg19[%c0_30, %c0_31] : memref<1x1xf32, #tpu.memory_space<vmem>>, vector<1x1xf32>
    tpu.vector_store %arg19[%c0_30, %c0_31], %55 {strides = array<i32>} : memref<1x1xf32, #tpu.memory_space<vmem>>, vector<1x1xf32>,
    %c0_32 = arith.constant 0 : index
    %c0_33 = arith.constant 0 : index
    %57 = vector.load %arg20[%c0_32, %c0_33] : memref<1x64xf32, #tpu.memory_space<vmem>>, vector<1x64xf32>
    %58 = vector.broadcast %47 : vector<1x1xf32> to vector<1x64xf32>
    %59 = arith.mulf %58, %57 : vector<1x64xf32>
    %60 = arith.truncf %50 : vector<1x128xf32> to vector<1x128xbf16>
    %c0_34 = arith.constant 0 : index
    %c0_35 = arith.constant 0 : index
    %c0_36 = arith.constant 0 : index
    %61 = vector.load %arg8[%c0_34, %c0_35, %c0_36] : memref<1x128x64xbf16, #tpu.memory_space<vmem>>, vector<1x128x64xbf16>
    %62 = vector.shape_cast %61 : vector<1x128x64xbf16> to vector<128x64xbf16>
    %cst_37 = arith.constant dense<0.000000e+00> : vector<1x64xf32>
    %63 = tpu.matmul %60, %62, %cst_37 {dimension_numbers = #tpu.dot_dimension_numbers<[1], [0], [0], [1], [0, 0, 1, 1], [], []>} : vector<1x128xbf16>, vector<128x64xbf16>, vector<1x64xf32> -> vector<1x64xf32>
    %64 = arith.addf %59, %63 : vector<1x64xf32>
    %c0_38 = arith.constant 0 : index
    %c0_39 = arith.constant 0 : index
    %65 = vector.load %arg20[%c0_38, %c0_39] : memref<1x64xf32, #tpu.memory_space<vmem>>, vector<1x64xf32>
    tpu.vector_store %arg20[%c0_38, %c0_39], %64 {strides = array<i32>} : memref<1x64xf32, #tpu.memory_space<vmem>>, vector<1x64xf32>,
    %c0_40 = arith.constant 0 : index
    %c0_41 = arith.constant 0 : index
    %66 = vector.load %arg18[%c0_40, %c0_41] : memref<1x1xf32, #tpu.memory_space<vmem>>, vector<1x1xf32>
    tpu.vector_store %arg18[%c0_40, %c0_41], %45 {strides = array<i32>} : memref<1x1xf32, #tpu.memory_space<vmem>>, vector<1x1xf32>,
    %c0_i32_42 = arith.constant 0 : i32
    %67 = arith.cmpi eq, %arg1, %c0_i32_42 : i32
    %68 = arith.extui %67 : i1 to i32
    %c0_i32_43 = arith.constant 0 : i32
    %69 = arith.cmpi ne, %68, %c0_i32_43 : i32
    scf.if %69 {
      %c0_44 = arith.constant 0 : index
      %c0_45 = arith.constant 0 : index
      %70 = vector.load %arg19[%c0_44, %c0_45] : memref<1x1xf32, #tpu.memory_space<vmem>>, vector<1x1xf32>
      %cst_46 = arith.constant 1.000000e+00 : f32
      %71 = vector.broadcast %cst_46 : f32 to vector<1x1xf32>
      %72 = arith.divf %71, %70 : vector<1x1xf32>
      %c0_47 = arith.constant 0 : index
      %c0_48 = arith.constant 0 : index
      %73 = vector.load %arg20[%c0_47, %c0_48] : memref<1x64xf32, #tpu.memory_space<vmem>>, vector<1x64xf32>
      %74 = vector.broadcast %72 : vector<1x1xf32> to vector<1x64xf32>
      %75 = arith.mulf %73, %74 : vector<1x64xf32>
      %c0_49 = arith.constant 0 : index
      %c0_50 = arith.constant 0 : index
      %c0_51 = arith.constant 0 : index
      %76 = vector.load %arg14[%c0_49, %c0_50, %c0_51] : memref<1x1x64xf32, #tpu.memory_space<vmem>>, vector<1x1x64xf32>
      %77 = vector.shape_cast %76 : vector<1x1x64xf32> to vector<1x64xf32>
      %78 = vector.shape_cast %75 : vector<1x64xf32> to vector<1x1x64xf32>
      tpu.vector_store %arg14[%c0_49, %c0_50, %c0_51], %78 {strides = array<i32>} : memref<1x1x64xf32, #tpu.memory_space<vmem>>, vector<1x1x64xf32>,
      %c0_52 = arith.constant 0 : index
      %c0_53 = arith.constant 0 : index
      %c0_54 = arith.constant 0 : index
      %79 = vector.load %arg15[%c0_52, %c0_53, %c0_54] : memref<1x1x128xf32, #tpu.memory_space<vmem>>, vector<1x1x128xf32>
      %c0_55 = arith.constant 0 : index
      %c0_56 = arith.constant 0 : index
      %80 = vector.load %arg18[%c0_55, %c0_56] : memref<1x1xf32, #tpu.memory_space<vmem>>, vector<1x1xf32>
      %81 = vector.shape_cast %80 : vector<1x1xf32> to vector<1x1x1xf32>
      %82 = vector.broadcast %81 : vector<1x1x1xf32> to vector<1x1x128xf32>
      %83 = arith.subf %79, %82 : vector<1x1x128xf32>
      %84 = math.exp %83 : vector<1x1x128xf32>
      %85 = vector.shape_cast %72 : vector<1x1xf32> to vector<1x1x1xf32>
      %86 = vector.broadcast %85 : vector<1x1x1xf32> to vector<1x1x128xf32>
      %87 = arith.mulf %84, %86 : vector<1x1x128xf32>
      %c0_57 = arith.constant 0 : index
      %c0_58 = arith.constant 0 : index
      %c0_59 = arith.constant 0 : index
      %88 = vector.load %arg15[%c0_57, %c0_58, %c0_59] : memref<1x1x128xf32, #tpu.memory_space<vmem>>, vector<1x1x128xf32>
      tpu.vector_store %arg15[%c0_57, %c0_58, %c0_59], %87 {strides = array<i32>} : memref<1x1x128xf32, #tpu.memory_space<vmem>>, vector<1x1x128xf32>,
    } else {
    }
    return
  }
  func.func @transform_0(%arg0: i32, %arg1: i32) -> (i32, i32, i32) {
    %c0_i32 = arith.constant 0 : i32
    %c0_i32_0 = arith.constant 0 : i32
    %c0_i32_1 = arith.constant 0 : i32
    return %arg0, %c0_i32, %c0_i32_0 : i32, i32, i32
  }
  func.func @transform_1(%arg0: i32, %arg1: i32) -> (i32, i32, i32) {
    %c0_i32 = arith.constant 0 : i32
    %c0_i32_0 = arith.constant 0 : i32
    %c0_i32_1 = arith.constant 0 : i32
    return %arg0, %c0_i32, %c0_i32_0 : i32, i32, i32
  }
  func.func @transform_2(%arg0: i32, %arg1: i32) -> (i32, i32, i32) {
    %c0_i32 = arith.constant 0 : i32
    %c0_i32_0 = arith.constant 0 : i32
    %c0_i32_1 = arith.constant 0 : i32
    return %arg0, %c0_i32, %c0_i32_0 : i32, i32, i32
  }
  func.func @transform_3(%arg0: i32, %arg1: i32) -> (i32, i32, i32) {
    %c0_i32 = arith.constant 0 : i32
    %c0_i32_0 = arith.constant 0 : i32
    %c0_i32_1 = arith.constant 0 : i32
    return %arg0, %c0_i32, %c0_i32_0 : i32, i32, i32
  }
  func.func @transform_4(%arg0: i32, %arg1: i32) -> (i32, i32, i32) {
    %c0_i32 = arith.constant 0 : i32
    %c0_i32_0 = arith.constant 0 : i32
    %c0_i32_1 = arith.constant 0 : i32
    return %arg0, %c0_i32, %c0_i32_0 : i32, i32, i32
  }
  func.func @transform_5(%arg0: i32, %arg1: i32) -> (i32, i32, i32) {
    %c0_i32 = arith.constant 0 : i32
    %c0_i32_0 = arith.constant 0 : i32
    return %arg0, %arg1, %c0_i32 : i32, i32, i32
  }
  func.func @transform_6(%arg0: i32, %arg1: i32) -> (i32, i32, i32) {
    %c0_i32 = arith.constant 0 : i32
    %c0_i32_0 = arith.constant 0 : i32
    return %arg0, %arg1, %c0_i32 : i32, i32, i32
  }
  func.func @transform_7(%arg0: i32, %arg1: i32) -> (i32, i32, i32) {
    %c0_i32 = arith.constant 0 : i32
    %c0_i32_0 = arith.constant 0 : i32
    return %arg0, %c0_i32, %arg1 : i32, i32, i32
  }
  func.func @transform_8(%arg0: i32, %arg1: i32) -> (i32, i32, i32) {
    %c0_i32 = arith.constant 0 : i32
    %c0_i32_0 = arith.constant 0 : i32
    return %arg0, %c0_i32, %arg1 : i32, i32, i32
  }
  func.func @transform_9(%arg0: i32, %arg1: i32) -> (i32, i32, i32) {
    %c0_i32 = arith.constant 0 : i32
    %c0_i32_0 = arith.constant 0 : i32
    %c0_i32_1 = arith.constant 0 : i32
    %c0_i32_2 = arith.constant 0 : i32
    return %c0_i32, %c0_i32_0, %c0_i32_1 : i32, i32, i32
  }
  func.func @transform_10(%arg0: i32, %arg1: i32) -> (i32, i32) {
    %c0_i32 = arith.constant 0 : i32
    %c0_i32_0 = arith.constant 0 : i32
    %c0_i32_1 = arith.constant 0 : i32
    return %c0_i32, %c0_i32_0 : i32, i32
  }
  func.func @transform_11(%arg0: i32, %arg1: i32) -> (i32, i32) {
    %c0_i32 = arith.constant 0 : i32
    %c0_i32_0 = arith.constant 0 : i32
    %c0_i32_1 = arith.constant 0 : i32
    return %c0_i32, %c0_i32_0 : i32, i32
  }
  func.func @transform_12(%arg0: i32, %arg1: i32) -> (i32, i32, i32) {
    %c0_i32 = arith.constant 0 : i32
    %c0_i32_0 = arith.constant 0 : i32
    %c0_i32_1 = arith.constant 0 : i32
    return %arg0, %c0_i32, %c0_i32_0 : i32, i32, i32
  }
  func.func @transform_13(%arg0: i32, %arg1: i32) -> (i32, i32, i32) {
    %c0_i32 = arith.constant 0 : i32
    %c0_i32_0 = arith.constant 0 : i32
    %c0_i32_1 = arith.constant 0 : i32
    return %arg0, %c0_i32, %c0_i32_0 : i32, i32, i32
  }
  func.func @transform_14(%arg0: i32, %arg1: i32) -> (i32, i32, i32) {
    %c0_i32 = arith.constant 0 : i32
    %c0_i32_0 = arith.constant 0 : i32
    %c0_i32_1 = arith.constant 0 : i32
    return %arg0, %c0_i32, %c0_i32_0 : i32, i32, i32
  }
}

</mosaic_0001>

<bundles_post_ra>
// kernel: bahdanau_attention_forward.1
= control target key start
LH: loop header
LB: loop body
LE: loop exit
PB: predicated region body
PF: predicated region fallthrough
CT: control target
= control target key end

     0   :  { %s3511_s0 = inlined_call_operand.vmem [shape: bf16[2,128,64], index: 0, kind: input, shape index: {}]   ;;  %s3512_s1 = inlined_call_operand.vmem [shape: bf16[2,128,64], index: 1, kind: input, shape index: {}]   ;;  %s3513_s2 = inlined_call_operand.vmem [shape: bf16[2,1,128], index: 2, kind: input, shape index: {}]   ;;  %s3514_s3 = inlined_call_operand.vmem [shape: f32[2,1,128], index: 3, kind: input, shape index: {}]   ;;  %s3515_s4 = inlined_call_operand.vmem [shape: f32[2,1,32], index: 4, kind: input, shape index: {}]   ;;  %s3516_s5 = inlined_call_operand.vmem [shape: bf16[2,128,64], index: 5, kind: input, shape index: {}]   ;;  %s3517_s6 = inlined_call_operand.vmem [shape: bf16[2,128,64], index: 6, kind: input, shape index: {}]   ;;  %s3518_s7 = inlined_call_operand.vmem [shape: bf16[2,1,128], index: 7, kind: input, shape index: {}]   ;;  %s3519_s8 = inlined_call_operand.vmem [shape: f32[2,1,128], index: 8, kind: input, shape index: {}]   ;;  %s3520_s9 = inlined_call_operand.vmem [shape: bf16[3,64,64], index: 9, kind: input, shape index: {}]   ;;  %s3521_s10 = inlined_call_operand.vmem [shape: f32[6,64], index: 10, kind: input, shape index: {}]   ;;  %s3522_s11 = inlined_call_operand.vmem [shape: f32[32,128], index: 11, kind: input, shape index: {}]   ;;  %s3523_s12 = inlined_call_operand.hbm [shape: f32[2,1,64], index: 12, kind: output, shape index: {0}]   ;;  %s3524_s13 = inlined_call_operand.vmem [shape: f32[2,1,128], index: 13, kind: output, shape index: {1}]   ;;  %s3525_s14 = inlined_call_operand.vmem [shape: f32[2,1,128], index: 14, kind: output, shape index: {2}]  }
   0x1   :  { %3533 = sst [smem:[#allocation16_spill]] %s3514_s3 }
   0x2   :  { %20 = vsyncpa [#allocation7], 0 }
   0x3   :  { %22 = vsyncpa [#allocation7 + $0x1], 0  ;;  %s2984_s29 = smov 0   ;;  %s2986_s30 = smov 0  }
   0x4   :  { %s2988_s15 = smov 0   ;;  %s2990_s16 = smov 0  }
   0x5   :  { %s2992_s17 = smov 0   ;;  %s2994_s18 = smov 0  }
   0x6 LB: > { %3534 = sst [smem:[#allocation9_spill]] %s2880_s29  ;;  %s2399_s19 = sadd.s32 4294967295, %s2900_s18   ;;  %s2900_s18 = sphi %s2994_s18, %s28_s18   ;;  %s2896_s17 = sphi %s2992_s17, %s3550_s17   ;;  %s2892_s16 = sphi %s2990_s16, %s3549_s16   ;;  %s2888_s15 = sphi %s2988_s15, %s3548_s15   ;;  %s2884_s30 = sphi %s2986_s30, %s3552_s30   ;;  %s2880_s29 = sphi %s2984_s29, %s3551_s29  }
   0x7   : > { %3535 = sst [smem:[#allocation10_spill]] %s2888_s15  ;;  %s2400_s20 = sadd.s32 4294967294, %s2900_s18  }
   0x8   : > { %3536 = sst [smem:[#allocation11_spill]] %s2896_s17  ;;  %s40_s21 = sadd.s32 1, %s2896_s17 }
   0x9   : > { %3537 = sst [smem:[#allocation12_spill]] %s2900_s18  ;;  %s352_s22 = sadd.s32 1, %s2888_s15 }
   0xa   : > { %p42_p0 = scmp.ge.s32.totalorder %s40_s21, 2  ;;  %p362_p1 = scmp.ne.s32.totalorder %s2888_s15, %s2884_s30 }
   0xb   : > { %p363_p2 = scmp.eq.s32.totalorder %s2399_s19, 1  ;;  %p368_p3 = scmp.ne.s32.totalorder %s2884_s30, %s2880_s29 }
   0xc   : > { %s3554_s21 = smov (%p42_p0, %s40_s21), 0  ;;  %p369_p5 = scmp.eq.s32.totalorder %s2400_s20, 1 }
   0xd   : > { %3538 = sst [smem:[#allocation13_spill]] %s3554_s21  ;;  %p3024_p4 = por %p363_p2, %p362_p1 }
   0xe   : > { %s349_s24 = ssub.s32 %s2896_s17, %s3554_s21  ;;  %p2403_p6 = scmp.ge.s32.totalorder %s2900_s18, 1 }
   0xf   : > { %p350_p7 = scmp.eq.s32.totalorder %s349_s24, 0  ;;  %p3031_p8 = por %p369_p5, %p368_p3 }
  0x10   : > { %p526_p9 = scmp.lt.s32.totalorder %s2900_s18, 3 }
  0x11   : > { %s3540_s25 = scalar_select %p3031_p8, 1, 0 }
  0x12   : > { %s3037_s26 = scalar_select %p350_p7, %s2888_s15, %s352_s22  }
  0x13   : > { %3541 = sst [smem:[#allocation14_spill]] %s3540_s25  ;;  %p527_p10 = pnand %p2403_p6, %p526_p9 }
  0x14   : > { %3542 = sst [smem:[#allocation15_spill]] %s3037_s26  ;;  %p621_p11 = scmp.lt.s32.totalorder (!%p527_p10), %s2892_s16, 1  ;;  %v2734_v0 = vld [vmem:[%s3520_s9] sm:$0xff] (!%p527_p10)   ;;  %v2735_v1 = vld [vmem:[%s3520_s9 + $0x8] sm:$0xff] (!%p527_p10)   ;;  %v2736_v2 = vld [vmem:[%s3520_s9 + $0x10] sm:$0xff] (!%p527_p10)   ;;  %v2902_v3 = vmov (!%p527_p10), 0.0|0.0   ;;  %v831_v39 = vlaneseq (!%p527_p10) }
  0x15   : > { %530 = sbr.rel (%p527_p10) target bundleno = 2545 (0x9f1), region = 68  ;;  %2565 = vmatprep.subr.bf16.mxu1 (!%p527_p10), %v2734_v0  ;;  %s3543_s3 = sld [smem:[#allocation16_spill]] (!%p527_p10)  ;;  %2665 = vmatprep.subr.bf16.mxu0 (!%p527_p10), %v2902_v3  ;;  %v690_v4 = vld [vmem:[%s3522_s11] sm:$0xff] (!%p527_p10)  ;;  %v691_v5 = vld [vmem:[%s3522_s11 + $0x8] sm:$0xff] (!%p527_p10)  ;;  %v692_v6 = vld [vmem:[%s3522_s11 + $0x10] sm:$0xff] (!%p527_p10)  ;;  %vm899_vm0 = vcmask (!%p527_p10), 523264  }
  0x16   : > { %2566 = vmatpush3.bf16.msra.mxu1 (!%p527_p10), %v2734_v0  ;;  %v2666_v8 = vpack.c.bf16 (!%p527_p10), %v691_v5, %v690_v4  ;;  %v693_v9 = vld [vmem:[%s3522_s11 + $0x18] sm:$0xff] (!%p527_p10)  ;;  %vm2903_vm1 = vmmov (!%p527_p10), 0   ;;  %v2904_v10 = vmov (!%p527_p10), 0.0   ;;  %v2905_v11 = vmov (!%p527_p10), 0   ;;  %v683_v41 = vld [vmem:[%s3521_s10 + $0x4] sm:$0x1] (!%p527_p10) }
  0x17   : > { %2567 = vmatprep.subr.bf16.mxu1 (!%p527_p10), %v2735_v1  ;;  %2562 = vmatprep.mubr.msk.f32.mxu0 (!%p527_p10), %vm2903_vm1, %v2904_v10  ;;  %v2669_v13 = vpack.c.bf16 (!%p527_p10), %v693_v9, %v692_v6  ;;  %v2737_v14 = vld [vmem:[%s3520_s9 + $0x18] sm:$0xff] (!%p527_p10)   ;;  %vm694_vm2 = vcmask (!%p527_p10), 261120   ;;  %v832_v40 = vshrl.u32 (!%p527_p10), %v831_v39, 7  ;;  %vm1272_vm3 = vcmask (!%p527_p10), 1040384   ;;  %s2908_s22 = smov (!%p527_p10), [#allocation6]  }
  0x18   : > { %2733 = vset.pattern.permute.xlu1 (!%p527_p10), %v2905_v11  ;;  %2667 = vmatpush3.bf16.msra.mxu0 (!%p527_p10), %v2666_v8  ;;  %vm1477_vm4 = vcmask (!%p527_p10), 516096   ;;  %vm1479_vm5 = vcmask (!%p527_p10), 0   ;;  %s2826_s17 = sshll.u32 (!%p527_p10), %s2908_s22, 4  ;;  %s2827_s17 = int_to_ptr.vmem [resolvable:$false] %s2826_s17 }
  0x19   : > { %2668 = vmatprep.subr.bf16.mxu0 (!%p527_p10), %v2902_v3  ;;  %v3129_v42 = vsub.s32 (!%p527_p10), 0, %v832_v40  ;;  %1482 = vst.msk [vmem:[#allocation5] sm:$0x1] (!%p527_p10), %vm1477_vm4, %v2904_v10 }
  0x1a   : > { %2568 = vmatpush3.bf16.msra.mxu1 (!%p527_p10), %v2735_v1  ;;  %1481 = vst.msk [vmem:[#allocation4] sm:$0x1] (!%p527_p10), %vm1479_vm5, %v2904_v10 }
  0x1b   : > { %2569 = vmatprep.subr.bf16.mxu1 (!%p527_p10), %v2736_v2 }
  0x1c   : > { %s3047_s24 = scalar_select %p621_p11, %s2892_s16, 1  ;;  %2670 = vmatpush3.bf16.msra.mxu0 %v2669_v13 }
  0x1d   : > { %2589 = vmatprep.subr.bf16.mxu0 %v2904_v10 }
  0x1e   : > { %s636_s15 = scalar_lea.vmem %s3543_s3, %s3047_s24  ;;  %s3057_s27 = sshll.u32 %s3047_s24, 6  ;;  %2570 = vmatpush3.bf16.msra.mxu1 %v2736_v2 }
  0x1f   : > { %v798_v7 = vld [vmem:[%s636_s15] sm:$0x1]  ;;  %s3072_s3 = scalar_lea.vmem %s3512_s1, %s3057_s27  ;;  %s3083_s28 = scalar_lea.vmem %s3511_s0, %s3057_s27  ;;  %2571 = vmatprep.subr.bf16.mxu1 %v2737_v14 }
  0x20   : > { %799 = vxpose.xlu0.b32.start.end [1/1] (short) %v798_v7, 128  ;;  %v2738_v12 = vld [vmem:[%s3083_s28] sm:$0xff]   ;;  %s639_s21 = scalar_lea.vmem %s3515_s4, %s3047_s24  ;;  %v2739_v16 = vld [vmem:[%s3083_s28 + $0x8] sm:$0xff]   ;;  %v2740_v17 = vld [vmem:[%s3083_s28 + $0x10] sm:$0xff]   ;;  %s3108_s26 = scalar_lea.vmem %s3516_s5, %s3057_s27 }
  0x21   : > { %2573 = vmatprep.mubr.msk.bf16.mxu1 %vm899_vm0, %v2738_v12  ;;  %v689_v15 = vld [vmem:[%s639_s21] sm:$0x1]  ;;  %v2741_v18 = vld [vmem:[%s3083_s28 + $0x18] sm:$0xff]   ;;  %v2743_v20 = vld [vmem:[%s3083_s28 + $0x28] sm:$0xff]   ;;  %s3117_s29 = scalar_lea.vmem %s3517_s6, %s3057_s27  ;;  %s633_s25 = scalar_lea.vmem %s3513_s2, %s3047_s24 }
  0x22   : > { %2563 = vmatmul.mubr.msk.f32.vlgmr.msra.gmra.mrb[0].mxu0 %vm694_vm2, %v689_v15  ;;  %2572 = vmatpush3.bf16.msra.mxu1 %v2737_v14  ;;  %v2742_v19 = vld [vmem:[%s3083_s28 + $0x20] sm:$0xff]   ;;  %v2744_v21 = vld [vmem:[%s3083_s28 + $0x30] sm:$0xff]   ;;  %v2745_v22 = vld [vmem:[%s3083_s28 + $0x38] sm:$0xff]   ;;  %s2906_s28 = smov 64   ;;  %s677_s18 = scalar_lea.vmem %s3525_s14, %s3047_s24 }
  0x23   : > { %2605 = vmatprep.mubr.msk.bf16.mxu0 %vm2903_vm1, %v2904_v10  ;;  %2609 = vmatprep.subr.bf16.mxu1 %v2904_v10  ;;  %s671_s19 = scalar_lea.vmem %s3519_s8, %s3047_s24  ;;  %s3429_s27 = scalar_lea.vmem %s3524_s13, %s3047_s24 }
  0x25   : > { %2574 = vmatmul.mubr.msk.bf16.vlgmr.msra.gmra.mrb[0].mxu1 %vm899_vm0, %v2739_v16  ;;  %v3152_v16 = vld [vmem:[%s3521_s10] ss:$0 sm:$0xff] }
  0x26   : > { %2577 = vmatprep.mubr.msk.bf16.mxu1 %vm899_vm0, %v2740_v17 }
  0x2d   : > { %2578 = vmatmul.mubr.msk.bf16.gmra.mrb[4].mxu1 %vm899_vm0, %v2741_v18 }
  0x2e   : > { %2581 = vmatprep.mubr.msk.bf16.mxu1 %vm899_vm0, %v2742_v19 }
  0x35   : > { %2582 = vmatmul.mubr.msk.bf16.gmra.mrb[8].mxu1 %vm899_vm0, %v2743_v20 }
  0x36   : > { %2585 = vmatprep.mubr.msk.bf16.mxu1 %vm899_vm0, %v2744_v21 }
  0x3d   : > { %2586 = vmatmul.mubr.msk.bf16.gmra.mrb[12].mxu1 %vm899_vm0, %v2745_v22 }
  0x3e   : > { %2617 = vmatprep.mubr.msk.bf16.mxu1 %vm2903_vm1, %v2904_v10 }
  0x49   : > { %2732 = vset.pattern.permute.xlu0 %v2905_v11 }
  0xa0   : > { %v815_v23 = vpop.trf.xlu0 }
  0xa1   : > { %1023 = vperm.xlu0 %2732, %v815_v23  }
  0xa4   : > { %v816_v24 = vpop.trf.xlu0 }
  0xa5   : > { %1028 = vperm.xlu1 %2733, %v816_v24  }
  0xa8   : > { %v817_v25 = vpop.trf.xlu0 }
  0xa9   : > { %1033 = vperm.xlu1 %2733, %v817_v25  }
  0xac   : > { %v818_v26 = vpop.trf.xlu0 }
  0xad   : > { %1038 = vperm.xlu1 %2733, %v818_v26  }
  0xb0   : > { %v819_v27 = vpop.trf.xlu0 }
  0xb1   : > { %1043 = vperm.xlu1 %2733, %v819_v27  }
  0xb4   : > { %v820_v28 = vpop.trf.xlu0 }
  0xb5   : > { %1048 = vperm.xlu1 %2733, %v820_v28  }
  0xb8   : > { %v821_v29 = vpop.trf.xlu0 }
  0xb9   : > { %1053 = vperm.xlu1 %2733, %v821_v29  }
  0xbc   : > { %v822_v30 = vpop.trf.xlu0 }
  0xbd   : > { %1058 = vperm.xlu1 %2733, %v822_v30  }
  0xc0   : > { %v823_v31 = vpop.trf.xlu0 }
  0xc1   : > { %1063 = vperm.xlu1 %2733, %v823_v31  }
  0xc4   : > { %v824_v32 = vpop.trf.xlu0 }
  0xc5   : > { %1068 = vperm.xlu1 %2733, %v824_v32  }
  0xc8   : > { %v825_v33 = vpop.trf.xlu0 }
  0xc9   : > { %1073 = vperm.xlu1 %2733, %v825_v33  }
  0xcc   : > { %v826_v34 = vpop.trf.xlu0 }
  0xcd   : > { %1078 = vperm.xlu1 %2733, %v826_v34  }
  0xd0   : > { %v827_v35 = vpop.trf.xlu0 }
  0xd1   : > { %1083 = vperm.xlu1 %2733, %v827_v35  }
  0xd4   : > { %v828_v36 = vpop.trf.xlu0 }
  0xd5   : > { %1088 = vperm.xlu1 %2733, %v828_v36  }
  0xd8   : > { %v829_v37 = vpop.trf.xlu0 }
  0xd9   : > { %1093 = vperm.xlu1 %2733, %v829_v37  }
  0xdc   : > { %v830_v38 = vpop.trf.xlu0 }
  0xdd   : > { %1098 = vperm.xlu1 %2733, %v830_v38  }
  0xf5   : > { %v3131_v43 = vpop.f32.mrb[0].mxu0 }
  0xf6   : > { %v768_v44 = vadd.f32 %v3131_v43, %v683_v41  ;;  %v2564_v45 = vpop.f32.mrb[1].mxu0 }
  0xf8   : > { %v834_v46 = vrot.slane %v768_v44, %v3129_v42  ;;  %v2575_v47 = vpop.f32.mrb[0].mxu1 }
  0xf9   : > { %v958_v49 = vpop.f32.mrb[1].mxu1 }
  0xfa   : > { %v967_v48 = vadd.f32 %v2575_v47, %v834_v46  ;;  %v959_v50 = vadd.f32 %v958_v49, %v834_v46  ;;  %v2576_v51 = vpop.f32.mrb[2].mxu1 }
  0xfb   : > { %v970_v52 = vadd.f32 %v2576_v51, %v834_v46  ;;  %v961_v53 = vpop.f32.mrb[3].mxu1  ;;  %v3165_v51 = vld [vmem:[%s3521_s10 + $0x1] ss:$0 sm:$0xff] }
  0xfc   : > { %v962_v54 = vadd.f32 %v961_v53, %v834_v46 }
 0x100   : > { %v2579_v55 = vpop.f32.mrb[4].mxu1 }
 0x101   : > { %v983_v56 = vadd.f32 %v2579_v55, %v834_v46  ;;  %v974_v57 = vpop.f32.mrb[5].mxu1 }
 0x102   : > { %v975_v58 = vadd.f32 %v974_v57, %v834_v46  ;;  %v2580_v59 = vpop.f32.mrb[6].mxu1 }
 0x103   : > { %v986_v60 = vadd.f32 %v2580_v59, %v834_v46  ;;  %v977_v61 = vpop.f32.mrb[7].mxu1 }
 0x104   : > { %v978_v62 = vadd.f32 %v977_v61, %v834_v46 }
 0x108   : > { %v2583_v63 = vpop.f32.mrb[8].mxu1 }
 0x109   : > { %v3135_v0 = vadd.f32 %v2583_v63, %v834_v46  ;;  %v990_v1 = vpop.f32.mrb[9].mxu1 }
 0x10a   : > { %v3137_v2 = vadd.f32 %v990_v1, %v834_v46  ;;  %v2584_v3 = vpop.f32.mrb[10].mxu1 }
 0x10b   : > { %v3139_v4 = vadd.f32 %v2584_v3, %v834_v46  ;;  %v993_v5 = vpop.f32.mrb[11].mxu1 }
 0x10c   : > { %v994_v6 = vadd.f32 %v993_v5, %v834_v46 }
 0x110   : > { %v2587_v7 = vpop.f32.mrb[12].mxu1 }
 0x111   : > { %v3141_v8 = vadd.f32 %v2587_v7, %v834_v46  ;;  %v1006_v9 = vpop.f32.mrb[13].mxu1 }
 0x112   : > { %v3143_v11 = vadd.f32 %v1006_v9, %v834_v46  ;;  %v2588_v12 = vpop.f32.mrb[14].mxu1 }
 0x113   : > { %v3145_v13 = vadd.f32 %v2588_v12, %v834_v46  ;;  %v1009_v14 = vpop.f32.mrb[15].mxu1 }
 0x114   : > { %v3147_v15 = vadd.f32 %v1009_v14, %v834_v46 }
 0x120   : > { %v1024_v17 = vpop.permute.xlu0 %1023 }
 0x121   : > { %v1105_v18 = vmul.f32 %v3152_v16, %v1024_v17 }
 0x123   : > { %v1121_v21 = vadd.f32 %v1105_v18, %v959_v50 }
 0x124   : > { %v1029_v19 = vpop.permute.xlu1 %1028 }
 0x125   : > { %v1106_v20 = vmul.f32 %v3152_v16, %v1029_v19 }
 0x127   : > { %v1122_v22 = vadd.f32 %v1106_v20, %v962_v54 }
 0x128   : > { %v1034_v23 = vpop.permute.xlu1 %1033 }
 0x129   : > { %v1137_v24 = vpack.c.bf16 %v1122_v22, %v1121_v21  ;;  %v1107_v25 = vmul.f32 %v3152_v16, %v1034_v23 }
 0x12b   : > { %v1123_v28 = vadd.f32 %v1107_v25, %v967_v48 }
 0x12c   : > { %v1039_v26 = vpop.permute.xlu1 %1038 }
 0x12d   : > { %v1108_v27 = vmul.f32 %v3152_v16, %v1039_v26 }
 0x12f   : > { %v1124_v29 = vadd.f32 %v1108_v27, %v970_v52 }
 0x130   : > { %v1044_v30 = vpop.permute.xlu1 %1043 }
 0x131   : > { %v1138_v31 = vpack.c.bf16 %v1124_v29, %v1123_v28  ;;  %v1109_v32 = vmul.f32 %v3152_v16, %v1044_v30 }
 0x133   : > { %2778 = vtanh.bf16 %v1138_v31  ;;  %v1125_v35 = vadd.f32 %v1109_v32, %v975_v58 }
 0x134   : > { %2780 = vtanh.bf16 %v1137_v24  ;;  %v1049_v33 = vpop.permute.xlu1 %1048 }
 0x135   : > { %v1110_v34 = vmul.f32 %v3152_v16, %v1049_v33 }
 0x137   : > { %v1126_v36 = vadd.f32 %v1110_v34, %v978_v62 }
 0x138   : > { %v1054_v37 = vpop.permute.xlu1 %1053 }
 0x139   : > { %v1139_v38 = vpack.c.bf16 %v1126_v36, %v1125_v35  ;;  %v1111_v39 = vmul.f32 %v3152_v16, %v1054_v37 }
 0x13b   : > { %2782 = vtanh.bf16 %v1139_v38  ;;  %v1127_v46 = vadd.f32 %v1111_v39, %v983_v56 }
 0x13c   : > { %v1059_v40 = vpop.permute.xlu1 %1058 }
 0x13d   : > { %v1112_v41 = vmul.f32 %v3152_v16, %v1059_v40 }
 0x13e   : > { %v2779_v44 = vpop.eup %2778 }
 0x13f   : > { %v2781_v45 = vpop.eup %2780  ;;  %v1128_v47 = vadd.f32 %v1112_v41, %v986_v60  ;;  %v1155_v48 = vunpack.c.l.bf16 %v2779_v44  ;;  %v1156_v49 = vunpack.c.h.bf16 %v2779_v44 }
 0x140   : > { %v1064_v50 = vpop.permute.xlu1 %1063  ;;  %v1153_v54 = vunpack.c.l.bf16 %v2781_v45  ;;  %v1154_v62 = vunpack.c.h.bf16 %v2781_v45 }
 0x141   : > { %v1140_v52 = vpack.c.bf16 %v1128_v47, %v1127_v46  ;;  %v1175_v53 = vmul.f32 %v3165_v51, %v1155_v48  ;;  %v1113_v55 = vmul.f32 %v3152_v16, %v1064_v50  ;;  %v1176_v56 = vmul.f32 %v3165_v51, %v1156_v49 }
 0x142   : > { %v1173_v61 = vmul.f32 %v3165_v51, %v1153_v54  ;;  %v1174_v14 = vmul.f32 %v3165_v51, %v1154_v62 }
 0x143   : > { %2784 = vtanh.bf16 %v1140_v52  ;;  %v1195_v57 = vsel %vm899_vm0, %v1175_v53, 0.0  ;;  %v1129_v63 = vadd.f32 %v1113_v55, %v3137_v2  ;;  %v1198_v3 = vsel %vm899_vm0, %v1176_v56, 0.0 }
 0x144   : > { %v1069_v58 = vpop.permute.xlu1 %1068  ;;  %1196 = vadd.xlane.f32.xlu1 %v1195_v57  ;;  %v1189_v19 = vsel %vm899_vm0, %v1173_v61, 0.0  ;;  %v1192_v21 = vsel %vm899_vm0, %v1174_v14, 0.0 }
 0x145   : > { %v1114_v59 = vmul.f32 %v3152_v16, %v1069_v58 }
 0x146   : > { %v2783_v60 = vpop.eup %2782 }
 0x147   : > { %v1130_v1 = vadd.f32 %v1114_v59, %v994_v6  ;;  %v1157_v5 = vunpack.c.l.bf16 %v2783_v60  ;;  %v1158_v29 = vunpack.c.h.bf16 %v2783_v60 }
 0x148   : > { %v1074_v7 = vpop.permute.xlu1 %1073  ;;  %1199 = vadd.xlane.f32.xlu1 %v1198_v3 }
 0x149   : > { %v1141_v9 = vpack.c.bf16 %v1130_v1, %v1129_v63  ;;  %v1177_v12 = vmul.f32 %v3165_v51, %v1157_v5  ;;  %v1115_v17 = vmul.f32 %v3152_v16, %v1074_v7  ;;  %v1178_v36 = vmul.f32 %v3165_v51, %v1158_v29 }
 0x14b   : > { %v1201_v18 = vsel %vm899_vm0, %v1177_v12, 0.0  ;;  %v1131_v22 = vadd.f32 %v1115_v17, %v3135_v0  ;;  %2786 = vtanh.bf16 %v1141_v9  ;;  %v1204_v40 = vsel %vm899_vm0, %v1178_v36, 0.0  ;;  %v2748_v36 = vld [vmem:[%s3072_s3 + $0x10] sm:$0xff]  }
 0x14c   : > { %v1079_v20 = vpop.permute.xlu1 %1078  ;;  %1202 = vadd.xlane.f32.xlu0 %v1201_v18  ;;  %1190 = vadd.xlane.f32.xlu1 %v1189_v19 }
 0x14d   : > { %v1116_v2 = vmul.f32 %v3152_v16, %v1079_v20 }
 0x14e   : > { %v2785_v6 = vpop.eup %2784 }
 0x14f   : > { %v1132_v23 = vadd.f32 %v1116_v2, %v3139_v4  ;;  %v1159_v24 = vunpack.c.l.bf16 %v2785_v6  ;;  %v1160_v25 = vunpack.c.h.bf16 %v2785_v6 }
 0x150   : > { %v1084_v26 = vpop.permute.xlu1 %1083  ;;  %1193 = vadd.xlane.f32.xlu1 %v1192_v21 }
 0x151   : > { %v1142_v27 = vpack.c.bf16 %v1132_v23, %v1131_v22  ;;  %v1179_v28 = vmul.f32 %v3165_v51, %v1159_v24  ;;  %v1117_v30 = vmul.f32 %v3152_v16, %v1084_v26  ;;  %v1180_v32 = vmul.f32 %v3165_v51, %v1160_v25 }
 0x153   : > { %2788 = vtanh.bf16 %v1142_v27  ;;  %v1207_v31 = vsel %vm899_vm0, %v1179_v28, 0.0  ;;  %v1133_v4 = vadd.f32 %v1117_v30, %v3143_v11  ;;  %v1210_v35 = vsel %vm899_vm0, %v1180_v32, 0.0 }
 0x154   : > { %v1089_v33 = vpop.permute.xlu1 %1088  ;;  %1208 = vadd.xlane.f32.xlu1 %v1207_v31  ;;  %v1269_v31 = vld [vmem:[%s633_s25] sm:$0x1] }
 0x155   : > { %v1118_v0 = vmul.f32 %v3152_v16, %v1089_v33  ;;  %v1270_v32 = vunpack.c.l.bf16 %v1269_v31 }
 0x156   : > { %v2787_v41 = vpop.eup %2786 }
 0x157   : > { %v1134_v34 = vadd.f32 %v1118_v0, %v3147_v15  ;;  %v1161_v48 = vunpack.c.l.bf16 %v2787_v41  ;;  %v1162_v54 = vunpack.c.h.bf16 %v2787_v41 }
 0x158   : > { %v1094_v37 = vpop.permute.xlu1 %1093  ;;  %1211 = vadd.xlane.f32.xlu1 %v1210_v35  ;;  %v2747_v35 = vld [vmem:[%s3072_s3 + $0x8] sm:$0xff]  }
 0x159   : > { %v1143_v38 = vpack.c.bf16 %v1134_v34, %v1133_v4  ;;  %v1119_v39 = vmul.f32 %v3152_v16, %v1094_v37  ;;  %v1181_v53 = vmul.f32 %v3165_v51, %v1161_v48  ;;  %v2746_v34 = vld [vmem:[%s3072_s3] sm:$0xff]   ;;  %v2749_v37 = vld [vmem:[%s3072_s3 + $0x18] sm:$0xff]  }
 0x15a   : > { %2590 = vmatpush3.bf16.msra.mxu0 %v2746_v34  ;;  %v2754_v48 = vld [vmem:[%s3520_s9 + $0x40] sm:$0xff]  }
 0x15b   : > { %2790 = vtanh.bf16 %v1143_v38  ;;  %v1135_v15 = vadd.f32 %v1119_v39, %v3141_v8  ;;  %v1182_v8 = vmul.f32 %v3165_v51, %v1162_v54  ;;  %2591 = vmatprep.subr.bf16.mxu0 %v2904_v10  ;;  %2610 = vmatpush3.bf16.msra.mxu1 %v2754_v48 }
 0x15c   : > { %v1099_v44 = vpop.permute.xlu1 %1098  ;;  %1205 = vadd.xlane.f32.xlu1 %v1204_v40  ;;  %2611 = vmatprep.subr.bf16.mxu1 %v2904_v10 }
 0x15d   : > { %v1120_v45 = vmul.f32 %v3152_v16, %v1099_v44  ;;  %v1213_v16 = vsel %vm899_vm0, %v1181_v53, 0.0  ;;  %v1216_v59 = vsel %vm899_vm0, %v1182_v8, 0.0 }
 0x15e   : > { %v2789_v11 = vpop.eup %2788  ;;  %2592 = vmatpush3.bf16.msra.mxu0 %v2747_v35 }
 0x15f   : > { %v1136_v46 = vadd.f32 %v1120_v45, %v3145_v13  ;;  %v1163_v47 = vunpack.c.l.bf16 %v2789_v11  ;;  %v1164_v56 = vunpack.c.h.bf16 %v2789_v11  ;;  %2593 = vmatprep.subr.bf16.mxu0 %v2904_v10  ;;  %v2750_v45 = vld [vmem:[%s3072_s3 + $0x20] sm:$0xff]  }
 0x160   : > { %v684_v11 = vld [vmem:[%s3521_s10 + $0x5] sm:$0x1] }
 0x161   : > { %v1144_v49 = vpack.c.bf16 %v1136_v46, %v1135_v15  ;;  %v1183_v50 = vmul.f32 %v3165_v51, %v1163_v47  ;;  %v1184_v60 = vmul.f32 %v3165_v51, %v1164_v56  ;;  %v2751_v15 = vld [vmem:[%s3072_s3 + $0x28] sm:$0xff]   ;;  %v2752_v46 = vld [vmem:[%s3072_s3 + $0x30] sm:$0xff]   ;;  %v2753_v47 = vld [vmem:[%s3072_s3 + $0x38] sm:$0xff]   ;;  %s665_s3 = scalar_lea.vmem %s3518_s7, %s3047_s24  ;;  %s609_s24 = sand.u32 1, %s2884_s30  }
 0x162   : > { %2594 = vmatpush3.bf16.msra.mxu0 %v2748_v36 }
 0x163   : > { %2792 = vtanh.bf16 %v1144_v49  ;;  %v1219_v52 = vsel %vm899_vm0, %v1183_v50, 0.0  ;;  %v1222_v63 = vsel %vm899_vm0, %v1184_v60, 0.0  ;;  %2595 = vmatprep.subr.bf16.mxu0 %v2904_v10  ;;  %v2755_v49 = vld [vmem:[%s3520_s9 + $0x48] sm:$0xff]   ;;  %v2756_v50 = vld [vmem:[%s3520_s9 + $0x50] sm:$0xff]  }
 0x164   : > { %1220 = vadd.xlane.f32.xlu1 %v1219_v52  ;;  %2612 = vmatpush3.bf16.msra.mxu1 %v2755_v49  ;;  %v2757_v52 = vld [vmem:[%s3520_s9 + $0x58] sm:$0xff]   ;;  %v2759_v60 = vld [vmem:[%s3520_s9 + $0x28] sm:$0xff]  }
 0x165   : > { %2613 = vmatprep.subr.bf16.mxu1 %v2904_v10 }
 0x166   : > { %v2791_v55 = vpop.eup %2790  ;;  %2596 = vmatpush3.bf16.msra.mxu0 %v2749_v37 }
 0x167   : > { %v1165_v57 = vunpack.c.l.bf16 %v2791_v55  ;;  %v1166_v61 = vunpack.c.h.bf16 %v2791_v55  ;;  %2597 = vmatprep.subr.bf16.mxu0 %v2904_v10 }
 0x168   : > { %1214 = vadd.xlane.f32.xlu1 %v1213_v16  ;;  %2614 = vmatpush3.bf16.msra.mxu1 %v2756_v50 }
 0x169   : > { %v1185_v13 = vmul.f32 %v3165_v51, %v1165_v57  ;;  %v1186_v3 = vmul.f32 %v3165_v51, %v1166_v61  ;;  %2615 = vmatprep.subr.bf16.mxu1 %v2904_v10  ;;  %v2760_v61 = vld [vmem:[%s3520_s9 + $0x30] sm:$0xff]  }
 0x16a   : > { %2598 = vmatpush3.bf16.msra.mxu0 %v2750_v45 }
 0x16b   : > { %v1225_v58 = vsel %vm899_vm0, %v1185_v13, 0.0  ;;  %v1228_v12 = vsel %vm899_vm0, %v1186_v3, 0.0  ;;  %2599 = vmatprep.subr.bf16.mxu0 %v2904_v10  ;;  %v2764_v3 = vld [vmem:[%s3108_s26 + $0x10] sm:$0xff]  }
 0x16c   : > { %1226 = vadd.xlane.f32.xlu0 %v1225_v58  ;;  %1217 = vadd.xlane.f32.xlu1 %v1216_v59  ;;  %v2758_v59 = vld [vmem:[%s3520_s9 + $0x20] sm:$0xff]  }
 0x16d   : > { %2616 = vmatpush3.bf16.msra.mxu1 %v2757_v52 }
 0x16e   : > { %v2793_v62 = vpop.eup %2792  ;;  %2600 = vmatpush3.bf16.msra.mxu0 %v2751_v15  ;;  %2645 = vmatprep.subr.bf16.mxu1 %v2904_v10 }
 0x16f   : > { %v1167_v1 = vunpack.c.l.bf16 %v2793_v62  ;;  %v1168_v5 = vunpack.c.h.bf16 %v2793_v62  ;;  %2601 = vmatprep.subr.bf16.mxu0 %v2904_v10  ;;  %v2762_v62 = vld [vmem:[%s3108_s26] sm:$0xff]  }
 0x170   : > { %1223 = vadd.xlane.f32.xlu1 %v1222_v63  ;;  %v2761_v63 = vld [vmem:[%s3520_s9 + $0x38] sm:$0xff]  }
 0x171   : > { %v1187_v7 = vmul.f32 %v3165_v51, %v1167_v1  ;;  %v1188_v14 = vmul.f32 %v3165_v51, %v1168_v5  ;;  %v2763_v1 = vld [vmem:[%s3108_s26 + $0x8] sm:$0xff]   ;;  %v2765_v5 = vld [vmem:[%s3108_s26 + $0x18] sm:$0xff]  }
 0x172   : > { %2602 = vmatpush3.bf16.msra.mxu0 %v2752_v46 }
 0x173   : > { %v1231_v9 = vsel %vm899_vm0, %v1187_v7, 0.0  ;;  %v1234_v17 = vsel %vm899_vm0, %v1188_v14, 0.0  ;;  %2603 = vmatprep.subr.bf16.mxu0 %v2904_v10  ;;  %v2766_v7 = vld [vmem:[%s3108_s26 + $0x20] sm:$0xff]   ;;  %v2769_v14 = vld [vmem:[%s3108_s26 + $0x38] sm:$0xff]  }
 0x174   : > { %1232 = vadd.xlane.f32.xlu0 %v1231_v9  ;;  %1229 = vadd.xlane.f32.xlu1 %v1228_v12  ;;  %v2767_v9 = vld [vmem:[%s3108_s26 + $0x28] sm:$0xff]   ;;  %v2768_v12 = vld [vmem:[%s3108_s26 + $0x30] sm:$0xff]  }
 0x176   : > { %2604 = vmatpush3.bf16.msra.mxu0 %v2753_v47 }
 0x177   : > { %2621 = vmatprep.subr.bf16.mxu0 %v2758_v59 }
 0x178   : > { %1235 = vadd.xlane.f32.xlu1 %v1234_v17 }
 0x1d1   : > { %v1197_v18 = vpop.xlane.xlu1 %1196 }
 0x1d5   : > { %v1200_v19 = vpop.xlane.xlu1 %1199 }
 0x1d9   : > { %v1191_v20 = vpop.xlane.xlu1 %1190  ;;  %v1203_v22 = vpop.xlane.xlu0 %1202 }
 0x1da   : > { %1237 = vxpose.xlu0.b32.start [1/16] (narrow) %v1191_v20, 8 }
 0x1dd   : > { %v1194_v2 = vpop.xlane.xlu1 %1193 }
 0x1de   : > { %1238 = vxpose.xlu0.b32.cont [2/16] (narrow) %v1194_v2, 8  ;;  %v1508_v2 = vld [vmem:[%s671_s19] sm:$0x1] }
 0x1e1   : > { %v1209_v6 = vpop.xlane.xlu1 %1208 }
 0x1e2   : > { %1239 = vxpose.xlu0.b32.cont [3/16] (narrow) %v1197_v18, 8 }
 0x1e5   : > { %v1212_v21 = vpop.xlane.xlu1 %1211 }
 0x1e6   : > { %1240 = vxpose.xlu0.b32.cont [4/16] (narrow) %v1200_v19, 8 }
 0x1e9   : > { %v1206_v23 = vpop.xlane.xlu1 %1205 }
 0x1ea   : > { %1241 = vxpose.xlu0.b32.cont [5/16] (narrow) %v1203_v22, 8 }
 0x1ee   : > { %1242 = vxpose.xlu0.b32.cont [6/16] (narrow) %v1206_v23, 8 }
 0x1f1   : > { %v1221_v51 = vpop.xlane.xlu1 %1220 }
 0x1f2   : > { %1243 = vxpose.xlu0.b32.cont [7/16] (narrow) %v1209_v6, 8 }
 0x1f5   : > { %v1215_v24 = vpop.xlane.xlu1 %1214 }
 0x1f6   : > { %1244 = vxpose.xlu0.b32.cont [8/16] (narrow) %v1212_v21, 8 }
 0x1f9   : > { %v1218_v25 = vpop.xlane.xlu1 %1217  ;;  %v1227_v27 = vpop.xlane.xlu0 %1226 }
 0x1fa   : > { %1245 = vxpose.xlu0.b32.cont [9/16] (narrow) %v1215_v24, 8 }
 0x1fd   : > { %v1224_v26 = vpop.xlane.xlu1 %1223 }
 0x1fe   : > { %1246 = vxpose.xlu0.b32.cont [10/16] (narrow) %v1218_v25, 8 }
 0x201   : > { %v1230_v28 = vpop.xlane.xlu1 %1229  ;;  %v1233_v29 = vpop.xlane.xlu0 %1232 }
 0x202   : > { %1247 = vxpose.xlu0.b32.cont [11/16] (narrow) %v1221_v51, 8 }
 0x205   : > { %v1236_v30 = vpop.xlane.xlu1 %1235 }
 0x206   : > { %1248 = vxpose.xlu0.b32.cont [12/16] (narrow) %v1224_v26, 8 }
 0x20a   : > { %1249 = vxpose.xlu0.b32.cont [13/16] (narrow) %v1227_v27, 8 }
 0x20e   : > { %1250 = vxpose.xlu0.b32.cont [14/16] (narrow) %v1230_v28, 8 }
 0x212   : > { %1251 = vxpose.xlu0.b32.cont [15/16] (narrow) %v1233_v29, 8 }
 0x216   : > { %1252 = vxpose.xlu0.b32.end [16/16] (narrow) %v1236_v30, 8 }
 0x25a   : > { %v1253_v33 = vpop.trf.xlu0 }
 0x25b   : > { %v1271_v0 = vadd.f32 %v1270_v32, %v1253_v33 }
 0x25d   : > { %v1273_v4 = vsel %vm1272_vm3, %v1271_v0, -inf }
 0x25e   : > { %1274 = vmax.xlane.f32.xlu1 %v1273_v4 }
 0x2eb   : > { %v1275_v38 = vpop.xlane.xlu1 %1274 }
 0x2ec   : > { %v1276_v39 = vsub.f32 %v1271_v0, %v1275_v38 }
 0x2ee   : > { %v1277_v40 = vmul.f32 1.442695, %v1276_v39 }
 0x2f0   : > { %2794 = vpow2.f32 %v1277_v40 }
 0x2fa   : > { %v2795_v41 = vpop.eup %2794 }
 0x2fb   : > { %v1279_v44 = vsel %vm1272_vm3, %v2795_v41, 0.0 }
 0x2fc   : > { %1280 = vadd.xlane.f32.xlu1 %v1279_v44 }
 0x30d   : > { %770 = vrot.lane.b32.xlu1 %v684_v11, %s2906_s28 }
 0x389   : > { %v1281_v53 = vpop.xlane.xlu1 %1280 }
 0x38a   : > { %2796 = vrcp.f32 %v1281_v53 }
 0x38d   : > { %v771_v31 = vpop.permute.xlu1 %770 }
 0x38e   : > { %v773_v35 = vadd.f32 %v771_v31, %v3131_v43 }
 0x394   : > { %v2797_v54 = vpop.eup %2796 }
 0x395   : > { %v1284_v55 = vmul.f32 %v2797_v54, %v2795_v41  ;;  %v3331_v54 = vld [vmem:[%s3521_s10 + $0x2] ss:$0 sm:$0xff] }
 0x397   : > { %1285 = vst [vmem:[%s677_s18] sm:$0x1] %v1284_v55  ;;  %v1286_v16 = vpack.c.bf16 %v1284_v55, %v1284_v55  ;;  %s610_s18 = scalar_lea.vmem [#allocation6], %s609_s24 }
 0x398   : > { %s2192_s19 = sshll.u32 %s610_s18, 4  ;;  %s3464_s19 = int_to_ptr.vmem [resolvable:$true] %s2192_s19 }
 0x399   : > { %2606 = vmatmul.mubr.bf16.vlgmr.msra.gmra.mrb[4].mxu0 %v1286_v16  ;;  %s2822_s21 = scalar_lea.vmem %s3464_s19, 16  ;;  %p2829_p1 = scmp.lt.s32.totalorder %s3464_s19, %s2827_s17 }
 0x39a   : > { %2622 = vmatpush3.bf16.msra.mxu0 %v2758_v59  ;;  %2629 = vmatprep.mubr.msk.bf16.mxu0 %vm899_vm0, %v2762_v62  ;;  %p2823_p12 = scmp.ne.s32.totalorder %s3464_s19, %s2822_s21 }
 0x39b   : > { %2623 = vmatprep.subr.bf16.mxu0 %v2759_v60 }
 0x39c   : > { %p2824_p13 = pnand %p2823_p12, %p3024_p4 }
 0x39e   : > { %2624 = vmatpush3.bf16.msra.mxu0 %v2759_v60  ;;  %p2825_p0 = pneg %p2824_p13 }
 0x39f   : > { %2625 = vmatprep.subr.bf16.mxu0 %v2760_v61 }
 0x3a2   : > { %2626 = vmatpush3.bf16.msra.mxu0 %v2760_v61 }
 0x3a3   : > { %2627 = vmatprep.subr.bf16.mxu0 %v2761_v63 }
 0x3a6   : > { %2628 = vmatpush3.bf16.msra.mxu0 %v2761_v63 }
 0x3a9   : > { %2630 = vmatmul.mubr.msk.bf16.vlgmr.msra.gmra.mrb[8].mxu0 %vm899_vm0, %v2763_v1 }
 0x3aa   : > { %2633 = vmatprep.mubr.msk.bf16.mxu0 %vm899_vm0, %v2764_v3 }
 0x3b1   : > { %2634 = vmatmul.mubr.msk.bf16.gmra.mrb[12].mxu0 %vm899_vm0, %v2765_v5 }
 0x3b2   : > { %2637 = vmatprep.mubr.msk.bf16.mxu0 %vm899_vm0, %v2766_v7 }
 0x3b9   : > { %2638 = vmatmul.mubr.msk.bf16.gmra.mrb[16].mxu0 %vm899_vm0, %v2767_v9 }
 0x3ba   : > { %2641 = vmatprep.mubr.msk.bf16.mxu0 %vm899_vm0, %v2768_v12 }
 0x3c1   : > { %2642 = vmatmul.mubr.msk.bf16.gmra.mrb[20].mxu0 %vm899_vm0, %v2769_v14 }
 0x46c   : > { %v1385_v57 = vpop.f32.mrb[4].mxu0 }
 0x46d   : > { %v1391_v8 = vpack.c.bf16 %v1385_v57, %v1385_v57  ;;  %v2607_v56 = vpop.f32.mrb[5].mxu0 }
 0x46e   : > { %v1388_v13 = vpop.f32.mrb[6].mxu0 }
 0x46f   : > { %v2608_v58 = vpop.f32.mrb[7].mxu0  ;;  %2618 = vmatmul.mubr.msk.bf16.vlgmr.msra.gmra.mrb[16].mxu1 %vm899_vm0, %v1391_v8 }
 0x470   : > { %2661 = vmatprep.mubr.msk.bf16.mxu1 %vm2903_vm1, %v2904_v10 }
 0x47c   : > { %v3295_v6 = vpop.f32.mrb[8].mxu0 }
 0x47d   : > { %v1671_v21 = vpop.f32.mrb[9].mxu0 }
 0x47e   : > { %v3299_v22 = vpop.f32.mrb[10].mxu0 }
 0x47f   : > { %v1674_v23 = vpop.f32.mrb[11].mxu0 }
 0x484   : > { %v3301_v51 = vpop.f32.mrb[12].mxu0 }
 0x485   : > { %v3303_v24 = vpop.f32.mrb[13].mxu0 }
 0x486   : > { %v3305_v25 = vpop.f32.mrb[14].mxu0 }
 0x487   : > { %v3307_v26 = vpop.f32.mrb[15].mxu0 }
 0x48c   : > { %v3309_v27 = vpop.f32.mrb[16].mxu0 }
 0x48d   : > { %v3311_v28 = vpop.f32.mrb[17].mxu0 }
 0x48e   : > { %v3313_v29 = vpop.f32.mrb[18].mxu0 }
 0x48f   : > { %v3315_v30 = vpop.f32.mrb[19].mxu0 }
 0x494   : > { %v3317_v32 = vpop.f32.mrb[20].mxu0 }
 0x495   : > { %v3319_v33 = vpop.f32.mrb[21].mxu0 }
 0x496   : > { %v3321_v0 = vpop.f32.mrb[22].mxu0 }
 0x497   : > { %v3323_v34 = vpop.f32.mrb[23].mxu0 }
 0x542   : > { %v1462_v17 = vpop.f32.mrb[16].mxu1 }
 0x543   : > { %1469 = vrot.lane.b32.xlu1 %v1462_v17, %s2906_s28  ;;  %v2619_v18 = vpop.f32.mrb[17].mxu1 }
 0x544   : > { %v1465_v19 = vpop.f32.mrb[18].mxu1 }
 0x545   : > { %v2620_v20 = vpop.f32.mrb[19].mxu1 }
 0x56c   : > { %1509 = vxpose.xlu1.b32.start.end [1/1] (short) %v1508_v2, 128 }
 0x5b5   : > { %v1470_v4 = vpop.permute.xlu1 %1469 }
 0x5b6   : > { %v1472_v36 = vadd.f32 %v1470_v4, %v773_v35 }
 0x5c6   : > { %1474 = vrot.lane.b32.xlu1 %v1472_v36, %s2906_s28 }
 0x5ec   : > { %v1525_v37 = vpop.trf.xlu1 }
 0x5ed   : > { %1736 = vperm.xlu0 %2732, %v1525_v37  }
 0x5f0   : > { %v1526_v38 = vpop.trf.xlu1 }
 0x5f1   : > { %1741 = vperm.xlu0 %2732, %v1526_v38  }
 0x5f4   : > { %v1527_v39 = vpop.trf.xlu1 }
 0x5f5   : > { %1746 = vperm.xlu0 %2732, %v1527_v39  }
 0x5f8   : > { %v1528_v40 = vpop.trf.xlu1 }
 0x5f9   : > { %1751 = vperm.xlu0 %2732, %v1528_v40  }
 0x5fc   : > { %v1529_v41 = vpop.trf.xlu1 }
 0x5fd   : > { %1756 = vperm.xlu0 %2732, %v1529_v41  }
 0x600   : > { %v1530_v44 = vpop.trf.xlu1 }
 0x601   : > { %1761 = vperm.xlu1 %2733, %v1530_v44  }
 0x604   : > { %v1531_v45 = vpop.trf.xlu1 }
 0x605   : > { %1766 = vperm.xlu0 %2732, %v1531_v45  }
 0x608   : > { %v1532_v11 = vpop.trf.xlu1 }
 0x609   : > { %1771 = vperm.xlu1 %2733, %v1532_v11  }
 0x60c   : > { %v1533_v43 = vpop.trf.xlu1 }
 0x60d   : > { %1776 = vperm.xlu0 %2732, %v1533_v43  }
 0x610   : > { %v1534_v15 = vpop.trf.xlu1 }
 0x611   : > { %1781 = vperm.xlu1 %2733, %v1534_v15  }
 0x614   : > { %v1535_v46 = vpop.trf.xlu1 }
 0x615   : > { %1786 = vperm.xlu0 %2732, %v1535_v46  }
 0x618   : > { %v1536_v47 = vpop.trf.xlu1 }
 0x619   : > { %1791 = vperm.xlu1 %2733, %v1536_v47  }
 0x61c   : > { %v1537_v48 = vpop.trf.xlu1 }
 0x61d   : > { %1796 = vperm.xlu0 %2732, %v1537_v48  }
 0x620   : > { %v1538_v49 = vpop.trf.xlu1 }
 0x621   : > { %1801 = vperm.xlu1 %2733, %v1538_v49  }
 0x624   : > { %v1539_v50 = vpop.trf.xlu1 }
 0x625   : > { %1806 = vperm.xlu0 %2732, %v1539_v50  }
 0x628   : > { %v1540_v52 = vpop.trf.xlu1 }
 0x629   : > { %1811 = vperm.xlu1 %2733, %v1540_v52  }
 0x638   : > { %v1475_v53 = vpop.permute.xlu1 %1474 }
 0x639   : > { %1478 = vst.msk [vmem:[#allocation2] sm:$0x1] %vm1477_vm4, %v1475_v53 }
 0x640   : > { %v3333_v16 = vld [vmem:[#allocation2] ss:$0 sm:$0xff] }
 0x641   : > { %v1672_v56 = vadd.f32 %v3333_v16, %v1671_v21  ;;  %v1675_v13 = vadd.f32 %v3333_v16, %v1674_v23  ;;  %v1680_v3 = vadd.f32 %v3295_v6, %v3333_v16  ;;  %v1683_v5 = vadd.f32 %v3299_v22, %v3333_v16  ;;  %v3354_v22 = vld [vmem:[%s3521_s10 + $0x3] ss:$0 sm:$0xff] }
 0x642   : > { %v1688_v20 = vadd.f32 %v3333_v16, %v3303_v24  ;;  %v1691_v2 = vadd.f32 %v3333_v16, %v3307_v26  ;;  %v1696_v44 = vadd.f32 %v3301_v51, %v3333_v16  ;;  %v1699_v45 = vadd.f32 %v3305_v25, %v3333_v16 }
 0x643   : > { %v1704_v25 = vadd.f32 %v3333_v16, %v3311_v28 }
 0x66c   : > { %v1737_v55 = vpop.permute.xlu0 %1736 }
 0x66d   : > { %v1818_v57 = vmul.f32 %v3331_v54, %v1737_v55 }
 0x66f   : > { %v1834_v59 = vadd.f32 %v1818_v57, %v1672_v56 }
 0x670   : > { %v1742_v8 = vpop.permute.xlu0 %1741 }
 0x671   : > { %v1819_v58 = vmul.f32 %v3331_v54, %v1742_v8  ;;  %v1707_v8 = vadd.f32 %v3333_v16, %v3315_v30 }
 0x673   : > { %v1835_v60 = vadd.f32 %v1819_v58, %v1675_v13 }
 0x674   : > { %v1747_v61 = vpop.permute.xlu0 %1746 }
 0x675   : > { %v1850_v62 = vpack.c.bf16 %v1835_v60, %v1834_v59  ;;  %v1820_v63 = vmul.f32 %v3331_v54, %v1747_v61 }
 0x677   : > { %2798 = vtanh.bf16 %v1850_v62  ;;  %v1836_v9 = vadd.f32 %v1820_v63, %v1680_v3 }
 0x678   : > { %v1752_v1 = vpop.permute.xlu0 %1751 }
 0x679   : > { %v1821_v7 = vmul.f32 %v3331_v54, %v1752_v1 }
 0x67b   : > { %v1837_v12 = vadd.f32 %v1821_v7, %v1683_v5 }
 0x67c   : > { %v1757_v14 = vpop.permute.xlu0 %1756 }
 0x67d   : > { %v1851_v17 = vpack.c.bf16 %v1837_v12, %v1836_v9  ;;  %v1822_v18 = vmul.f32 %v3331_v54, %v1757_v14  ;;  %v1712_v12 = vadd.f32 %v3309_v27, %v3333_v16  ;;  %v1715_v14 = vadd.f32 %v3313_v29, %v3333_v16 }
 0x67f   : > { %2800 = vtanh.bf16 %v1851_v17  ;;  %v1838_v23 = vadd.f32 %v1822_v18, %v1688_v20 }
 0x680   : > { %v1762_v19 = vpop.permute.xlu1 %1761 }
 0x681   : > { %v1823_v6 = vmul.f32 %v3331_v54, %v1762_v19 }
 0x682   : > { %v2799_v21 = vpop.eup %2798 }
 0x683   : > { %v1839_v31 = vadd.f32 %v1823_v6, %v1691_v2  ;;  %v1867_v4 = vunpack.c.h.bf16 %v2799_v21  ;;  %v1866_v35 = vunpack.c.l.bf16 %v2799_v21 }
 0x684   : > { %v1767_v36 = vpop.permute.xlu0 %1766 }
 0x685   : > { %v1852_v37 = vpack.c.bf16 %v1839_v31, %v1838_v23  ;;  %v1887_v38 = vmul.f32 %v3354_v22, %v1867_v4  ;;  %v1886_v24 = vmul.f32 %v3354_v22, %v1866_v35  ;;  %v1824_v26 = vmul.f32 %v3331_v54, %v1767_v36 }
 0x687   : > { %2802 = vtanh.bf16 %v1852_v37  ;;  %v1905_v39 = vsel %vm899_vm0, %v1887_v38, 0.0  ;;  %v1902_v40 = vsel %vm899_vm0, %v1886_v24, 0.0  ;;  %v1840_v15 = vadd.f32 %v1824_v26, %v1696_v44 }
 0x688   : > { %1906 = vadd.xlane.f32.xlu1 %v1905_v39  ;;  %1903 = vadd.xlane.f32.xlu0 %v1902_v40  ;;  %v1772_v41 = vpop.permute.xlu1 %1771  ;;  %v1720_v37 = vadd.f32 %v3333_v16, %v3319_v33  ;;  %v1723_v38 = vadd.f32 %v3333_v16, %v3323_v34 }
 0x689   : > { %v1825_v11 = vmul.f32 %v3331_v54, %v1772_v41 }
 0x68a   : > { %v2801_v43 = vpop.eup %2800 }
 0x68b   : > { %v1841_v46 = vadd.f32 %v1825_v11, %v1699_v45  ;;  %v1868_v47 = vunpack.c.l.bf16 %v2801_v43  ;;  %v1869_v48 = vunpack.c.h.bf16 %v2801_v43 }
 0x68c   : > { %v1777_v49 = vpop.permute.xlu0 %1776 }
 0x68d   : > { %v1853_v50 = vpack.c.bf16 %v1841_v46, %v1840_v15  ;;  %v1888_v52 = vmul.f32 %v3354_v22, %v1868_v47  ;;  %v1826_v53 = vmul.f32 %v3331_v54, %v1777_v49  ;;  %v1889_v51 = vmul.f32 %v3354_v22, %v1869_v48 }
 0x68e   : > { %v1728_v48 = vadd.f32 %v3317_v32, %v3333_v16  ;;  %v1731_v49 = vadd.f32 %v3321_v0, %v3333_v16 }
 0x68f   : > { %2804 = vtanh.bf16 %v1853_v50  ;;  %v1908_v55 = vsel %vm899_vm0, %v1888_v52, 0.0  ;;  %v1842_v58 = vadd.f32 %v1826_v53, %v1704_v25  ;;  %v1911_v60 = vsel %vm899_vm0, %v1889_v51, 0.0 }
 0x690   : > { %1909 = vadd.xlane.f32.xlu0 %v1908_v55  ;;  %v1782_v57 = vpop.permute.xlu1 %1781 }
 0x691   : > { %v1827_v56 = vmul.f32 %v3331_v54, %v1782_v57 }
 0x692   : > { %v2803_v13 = vpop.eup %2802 }
 0x693   : > { %v1843_v59 = vadd.f32 %v1827_v56, %v1707_v8  ;;  %v1871_v61 = vunpack.c.h.bf16 %v2803_v13  ;;  %v1870_v62 = vunpack.c.l.bf16 %v2803_v13 }
 0x694   : > { %v1787_v63 = vpop.permute.xlu0 %1786  ;;  %1912 = vadd.xlane.f32.xlu0 %v1911_v60 }
 0x695   : > { %v1854_v1 = vpack.c.bf16 %v1843_v59, %v1842_v58  ;;  %v1891_v3 = vmul.f32 %v3354_v22, %v1871_v61  ;;  %v1890_v28 = vmul.f32 %v3354_v22, %v1870_v62  ;;  %v1828_v5 = vmul.f32 %v3331_v54, %v1787_v63 }
 0x697   : > { %2806 = vtanh.bf16 %v1854_v1  ;;  %v1917_v30 = vsel %vm899_vm0, %v1891_v3, 0.0  ;;  %v1914_v7 = vsel %vm899_vm0, %v1890_v28, 0.0  ;;  %v1844_v19 = vadd.f32 %v1828_v5, %v1712_v12 }
 0x698   : > { %1918 = vadd.xlane.f32.xlu0 %v1917_v30  ;;  %1915 = vadd.xlane.f32.xlu1 %v1914_v7  ;;  %v1792_v9 = vpop.permute.xlu1 %1791  ;;  %v2907_v12 = vmov -inf  }
 0x699   : > { %v1829_v17 = vmul.f32 %v3331_v54, %v1792_v9  ;;  %1480 = vst.msk [vmem:[#allocation3] sm:$0x1] %vm1479_vm5, %v2907_v12 }
 0x69a   : > { %v2805_v18 = vpop.eup %2804 }
 0x69b   : > { %v1845_v20 = vadd.f32 %v1829_v17, %v1715_v14  ;;  %v1873_v2 = vunpack.c.h.bf16 %v2805_v18  ;;  %v1872_v6 = vunpack.c.l.bf16 %v2805_v18 }
 0x69c   : > { %v1797_v21 = vpop.permute.xlu0 %1796 }
 0x69d   : > { %v1855_v23 = vpack.c.bf16 %v1845_v20, %v1844_v19  ;;  %v1893_v31 = vmul.f32 %v3354_v22, %v1873_v2  ;;  %v1892_v4 = vmul.f32 %v3354_v22, %v1872_v6  ;;  %v1830_v35 = vmul.f32 %v3331_v54, %v1797_v21 }
 0x69f   : > { %2808 = vtanh.bf16 %v1855_v23  ;;  %v1923_v27 = vsel %vm899_vm0, %v1893_v31, 0.0  ;;  %v1920_v29 = vsel %vm899_vm0, %v1892_v4, 0.0  ;;  %v1846_v39 = vadd.f32 %v1830_v35, %v1720_v37 }
 0x6a0   : > { %1924 = vadd.xlane.f32.xlu0 %v1923_v27  ;;  %1921 = vadd.xlane.f32.xlu1 %v1920_v29  ;;  %v1802_v36 = vpop.permute.xlu1 %1801  ;;  %v1982_v29 = vld [vmem:[%s665_s3] sm:$0x1]  ;;  %s2828_s3 = scalar_lea.vmem %s2827_s17, 32 }
 0x6a1   : > { %v1831_v24 = vmul.f32 %v3331_v54, %v1802_v36  ;;  %v1983_v36 = vunpack.c.l.bf16 %v1982_v29  ;;  %p2830_p2 = scmp.lt.s32.totalorder %s2828_s3, %s2822_s21 }
 0x6a2   : > { %v2807_v26 = vpop.eup %2806 }
 0x6a3   : > { %v1847_v40 = vadd.f32 %v1831_v24, %v1723_v38  ;;  %v1875_v41 = vunpack.c.h.bf16 %v2807_v26  ;;  %v1874_v44 = vunpack.c.l.bf16 %v2807_v26  ;;  %v2770_v26 = vld [vmem:[%s3117_s29] sm:$0xff]   ;;  %p2831_p3 = por %p2830_p2, %p2829_p1 }
 0x6a4   : > { %v1807_v45 = vpop.permute.xlu0 %1806  ;;  %2646 = vmatpush3.bf16.msra.mxu1 %v2770_v26 }
 0x6a5   : > { %v1856_v11 = vpack.c.bf16 %v1847_v40, %v1846_v39  ;;  %v1895_v43 = vmul.f32 %v3354_v22, %v1875_v41  ;;  %v1894_v15 = vmul.f32 %v3354_v22, %v1874_v44  ;;  %v1832_v46 = vmul.f32 %v3331_v54, %v1807_v45  ;;  %v2771_v39 = vld [vmem:[%s3117_s29 + $0x8] sm:$0xff]   ;;  %2647 = vmatprep.subr.bf16.mxu1 %v2904_v10  ;;  %v2772_v40 = vld [vmem:[%s3117_s29 + $0x10] sm:$0xff]   ;;  %v1990_v41 = vld [vmem:[#allocation3] sm:$0x1]  ;;  %p2832_p5 = pnand %p2831_p3, %p2825_p0 }
 0x6a7   : > { %2810 = vtanh.bf16 %v1856_v11  ;;  %v1929_v33 = vsel %vm899_vm0, %v1895_v43, 0.0  ;;  %v1926_v34 = vsel %vm899_vm0, %v1894_v15, 0.0  ;;  %v1848_v53 = vadd.f32 %v1832_v46, %v1728_v48  ;;  %v2773_v43 = vld [vmem:[%s3117_s29 + $0x18] sm:$0xff]   ;;  %v2774_v15 = vld [vmem:[%s3117_s29 + $0x20] sm:$0xff]   ;;  %v2775_v46 = vld [vmem:[%s3117_s29 + $0x28] sm:$0xff]  }
 0x6a8   : > { %1930 = vadd.xlane.f32.xlu0 %v1929_v33  ;;  %1927 = vadd.xlane.f32.xlu1 %v1926_v34  ;;  %v1812_v47 = vpop.permute.xlu1 %1811  ;;  %v2776_v33 = vld [vmem:[%s3117_s29 + $0x30] sm:$0xff]   ;;  %v2777_v34 = vld [vmem:[%s3117_s29 + $0x38] sm:$0xff]   ;;  %s2495_s29 = sshll.u32 %s2892_s16, 4  ;;  %s2174_s16 = scalar_lea.sflag [#allocation7], %s609_s24 }
 0x6a9   : > { %v1833_v50 = vmul.f32 %v3331_v54, %v1812_v47  ;;  %2648 = vmatpush3.bf16.msra.mxu1 %v2771_v39  ;;  %s3462_s20 = scalar_lea.hbm %s3523_s12, %s2495_s29 }
 0x6aa   : > { %v2809_v52 = vpop.eup %2808  ;;  %2649 = vmatprep.subr.bf16.mxu1 %v2904_v10 }
 0x6ab   : > { %v1849_v55 = vadd.f32 %v1833_v50, %v1731_v49  ;;  %v1877_v51 = vunpack.c.h.bf16 %v2809_v52  ;;  %v1876_v25 = vunpack.c.l.bf16 %v2809_v52 }
 0x6ad   : > { %v1857_v57 = vpack.c.bf16 %v1849_v55, %v1848_v53  ;;  %v1897_v8 = vmul.f32 %v3354_v22, %v1877_v51  ;;  %v1896_v56 = vmul.f32 %v3354_v22, %v1876_v25  ;;  %2650 = vmatpush3.bf16.msra.mxu1 %v2772_v40 }
 0x6ae   : > { %2651 = vmatprep.subr.bf16.mxu1 %v2904_v10 }
 0x6af   : > { %2812 = vtanh.bf16 %v1857_v57  ;;  %v1935_v13 = vsel %vm899_vm0, %v1897_v8, 0.0  ;;  %v1932_v32 = vsel %vm899_vm0, %v1896_v56, 0.0 }
 0x6b0   : > { %1936 = vadd.xlane.f32.xlu0 %v1935_v13  ;;  %1933 = vadd.xlane.f32.xlu1 %v1932_v32 }
 0x6b1   : > { %2652 = vmatpush3.bf16.msra.mxu1 %v2773_v43 }
 0x6b2   : > { %v2811_v0 = vpop.eup %2810  ;;  %2653 = vmatprep.subr.bf16.mxu1 %v2904_v10 }
 0x6b3   : > { %v1879_v16 = vunpack.c.h.bf16 %v2811_v0  ;;  %v1878_v54 = vunpack.c.l.bf16 %v2811_v0 }
 0x6b5   : > { %v1899_v58 = vmul.f32 %v3354_v22, %v1879_v16  ;;  %v1898_v59 = vmul.f32 %v3354_v22, %v1878_v54  ;;  %2654 = vmatpush3.bf16.msra.mxu1 %v2774_v15 }
 0x6b6   : > { %2655 = vmatprep.subr.bf16.mxu1 %v2904_v10 }
 0x6b7   : > { %v1941_v60 = vsel %vm899_vm0, %v1899_v58, 0.0  ;;  %v1938_v61 = vsel %vm899_vm0, %v1898_v59, 0.0  ;;  %v2019_v59 = vld [vmem:[#allocation5] sm:$0x1] }
 0x6b8   : > { %1942 = vadd.xlane.f32.xlu0 %v1941_v60  ;;  %1939 = vadd.xlane.f32.xlu1 %v1938_v61 }
 0x6b9   : > { %2656 = vmatpush3.bf16.msra.mxu1 %v2775_v46 }
 0x6ba   : > { %v2813_v62 = vpop.eup %2812  ;;  %2657 = vmatprep.subr.bf16.mxu1 %v2904_v10 }
 0x6bb   : > { %v1881_v63 = vunpack.c.h.bf16 %v2813_v62  ;;  %v1880_v1 = vunpack.c.l.bf16 %v2813_v62 }
 0x6bd   : > { %v1901_v3 = vmul.f32 %v3354_v22, %v1881_v63  ;;  %v1900_v28 = vmul.f32 %v3354_v22, %v1880_v1  ;;  %2658 = vmatpush3.bf16.msra.mxu1 %v2776_v33 }
 0x6be   : > { %2659 = vmatprep.subr.bf16.mxu1 %v2904_v10  ;;  %v2011_v10 = vld [vmem:[#allocation4] sm:$0x1] }
 0x6bf   : > { %v1947_v5 = vsel %vm899_vm0, %v1901_v3, 0.0  ;;  %v1944_v30 = vsel %vm899_vm0, %v1900_v28, 0.0 }
 0x6c0   : > { %1948 = vadd.xlane.f32.xlu0 %v1947_v5  ;;  %1945 = vadd.xlane.f32.xlu1 %v1944_v30 }
 0x6c1   : > { %2660 = vmatpush3.bf16.msra.mxu1 %v2777_v34 }
 0x715   : > { %v1904_v7 = vpop.xlane.xlu0 %1903  ;;  %v1907_v9 = vpop.xlane.xlu1 %1906 }
 0x716   : > { %1950 = vxpose.xlu1.b32.start [1/16] (narrow) %v1904_v7, 8 }
 0x71a   : > { %1951 = vxpose.xlu1.b32.cont [2/16] (narrow) %v1907_v9, 8 }
 0x71d   : > { %v1910_v14 = vpop.xlane.xlu0 %1909 }
 0x71e   : > { %1952 = vxpose.xlu1.b32.cont [3/16] (narrow) %v1910_v14, 8 }
 0x721   : > { %v1913_v22 = vpop.xlane.xlu0 %1912 }
 0x722   : > { %1953 = vxpose.xlu1.b32.cont [4/16] (narrow) %v1913_v22, 8 }
 0x725   : > { %v1916_v17 = vpop.xlane.xlu1 %1915  ;;  %v1919_v18 = vpop.xlane.xlu0 %1918 }
 0x726   : > { %1954 = vxpose.xlu1.b32.cont [5/16] (narrow) %v1916_v17, 8 }
 0x72a   : > { %1955 = vxpose.xlu1.b32.cont [6/16] (narrow) %v1919_v18, 8 }
 0x72d   : > { %v1922_v19 = vpop.xlane.xlu1 %1921  ;;  %v1925_v20 = vpop.xlane.xlu0 %1924 }
 0x72e   : > { %1956 = vxpose.xlu1.b32.cont [7/16] (narrow) %v1922_v19, 8 }
 0x732   : > { %1957 = vxpose.xlu1.b32.cont [8/16] (narrow) %v1925_v20, 8 }
 0x735   : > { %v1928_v2 = vpop.xlane.xlu1 %1927  ;;  %v1931_v6 = vpop.xlane.xlu0 %1930 }
 0x736   : > { %1958 = vxpose.xlu1.b32.cont [9/16] (narrow) %v1928_v2, 8 }
 0x73a   : > { %1959 = vxpose.xlu1.b32.cont [10/16] (narrow) %v1931_v6, 8 }
 0x73d   : > { %v1934_v21 = vpop.xlane.xlu1 %1933  ;;  %v1937_v23 = vpop.xlane.xlu0 %1936 }
 0x73e   : > { %1960 = vxpose.xlu1.b32.cont [11/16] (narrow) %v1934_v21, 8 }
 0x742   : > { %1961 = vxpose.xlu1.b32.cont [12/16] (narrow) %v1937_v23, 8 }
 0x745   : > { %v1940_v31 = vpop.xlane.xlu1 %1939  ;;  %v1943_v4 = vpop.xlane.xlu0 %1942 }
 0x746   : > { %1962 = vxpose.xlu1.b32.cont [13/16] (narrow) %v1940_v31, 8 }
 0x74a   : > { %1963 = vxpose.xlu1.b32.cont [14/16] (narrow) %v1943_v4, 8 }
 0x74d   : > { %v1946_v35 = vpop.xlane.xlu1 %1945  ;;  %v1949_v27 = vpop.xlane.xlu0 %1948 }
 0x74e   : > { %1964 = vxpose.xlu1.b32.cont [15/16] (narrow) %v1946_v35, 8 }
 0x752   : > { %1965 = vxpose.xlu1.b32.end [16/16] (narrow) %v1949_v27, 8 }
 0x796   : > { %v1966_v37 = vpop.trf.xlu1 }
 0x797   : > { %v1984_v38 = vadd.f32 %v1983_v36, %v1966_v37 }
 0x799   : > { %1989 = vst [vmem:[%s3429_s27] sm:$0x1] %v1984_v38  ;;  %v1992_v24 = vsel %vm1272_vm3, %v1984_v38, -inf }
 0x79a   : > { %1993 = vmax.xlane.f32.xlu0 %v1992_v24 }
 0x7a0   : > { %v2157_v5 = vld [vmem:[%s3429_s27] sm:$0x1] }
 0x827   : > { %v1994_v44 = vpop.xlane.xlu0 %1993 }
 0x828   : > { %v1995_v45 = vmax.f32 %v1990_v41, %v1994_v44 }
 0x82a   : > { %v1996_v11 = vsub.f32 %v1990_v41, %v1995_v45  ;;  %2138 = vst.msk [vmem:[#allocation3] sm:$0x1] %vm1479_vm5, %v1995_v45  ;;  %2001 = vperm.xlu0 %2732, %v1995_v45  }
 0x82c   : > { %v1997_v51 = vmul.f32 1.442695, %v1996_v11 }
 0x831   : > { %v2158_v25 = vld [vmem:[#allocation3] sm:$0x1] }
 0x8a9   : > { %v2002_v47 = vpop.permute.xlu0 %2001 }
 0x8aa   : > { %v2007_v48 = vrot.slane %v2002_v47, %v3129_v42 }
 0x8ac   : > { %v2008_v49 = vsub.f32 %v1984_v38, %v2007_v48 }
 0x8ae   : > { %v2009_v50 = vmul.f32 1.442695, %v2008_v49 }
 0x8b0   : > { %2814 = vpow2.f32 %v2009_v50 }
 0x8b1   : > { %2816 = vpow2.f32 %v1997_v51 }
 0x8ba   : > { %v2815_v52 = vpop.eup %2814 }
 0x8bb   : > { %v2013_v53 = vsel %vm1272_vm3, %v2815_v52, 0.0  ;;  %v2030_v55 = vpack.c.bf16 %v2815_v52, %v2815_v52  ;;  %v2817_v57 = vpop.eup %2816 }
 0x8bc   : > { %2014 = vadd.xlane.f32.xlu0 %v2013_v53  ;;  %v2012_v8 = vmul.f32 %v2817_v57, %v2011_v10 }
 0x8bd   : > { %2662 = vmatmul.mubr.bf16.vlgmr.msra.gmra.mrb[20].mxu1 %v2030_v55 }
 0x8d2   : > { %2161 = vperm.xlu0 %2732, %v2158_v25  }
 0x8d6   : > { %2022 = vperm.xlu0 %2732, %v2817_v57  }
 0x949   : > { %v2015_v56 = vpop.xlane.xlu0 %2014 }
 0x94a   : > { %v2016_v13 = vadd.f32 %v2015_v56, %v2012_v8 }
 0x94c   : > { %2018 = vst.msk [vmem:[#allocation4] sm:$0x1] %vm1479_vm5, %v2016_v13 }
 0x951   : > { %v2162_v16 = vpop.permute.xlu0 %2161 }
 0x952   : > { %v2167_v28 = vrot.slane %v2162_v16, %v3129_v42 }
 0x953   : > { %v2142_v32 = vld [vmem:[#allocation4] sm:$0x1] }
 0x954   : > { %2818 = vrcp.f32 %v2142_v32  ;;  %v2168_v30 = vsub.f32 %v2157_v5, %v2167_v28 }
 0x955   : > { %v2023_v54 = vpop.permute.xlu0 %2022 }
 0x956   : > { %v2028_v58 = vrot.slane %v2023_v54, %v3129_v42  ;;  %v2169_v7 = vmul.f32 1.442695, %v2168_v30 }
 0x958   : > { %v2029_v60 = vmul.f32 %v2028_v58, %v2019_v59  ;;  %2820 = vpow2.f32 %v2169_v7 }
 0x95e   : > { %v2819_v0 = vpop.eup %2818 }
 0x95f   : > { %2148 = vperm.xlu0 %2732, %v2819_v0  }
 0x962   : > { %v2821_v14 = vpop.eup %2820 }
 0x990   : > { %v2129_v61 = vpop.f32.mrb[20].mxu1 }
 0x991   : > { %v2135_v62 = vadd.f32 %v2129_v61, %v2029_v60  ;;  %v2663_v63 = vpop.f32.mrb[21].mxu1 }
 0x992   : > { %v2132_v1 = vpop.f32.mrb[22].mxu1 }
 0x993   : > { %2137 = vst.msk [vmem:[#allocation5] sm:$0x1] %vm1477_vm4, %v2135_v62  ;;  %v2664_v3 = vpop.f32.mrb[23].mxu1 }
 0x99a   : > { %v2145_v22 = vld [vmem:[#allocation5] sm:$0x1] }
 0x9de   : > { %v2149_v9 = vpop.permute.xlu0 %2148 }
 0x9df   : > { %v2154_v12 = vrot.slane %v2149_v9, %v3129_v42 }
 0x9e1   : > { %v2155_v17 = vmul.f32 %v2154_v12, %v2145_v22  ;;  %v2171_v18 = vmul.f32 %v2821_v14, %v2154_v12 }
 0x9e3   : > { %2172 = vst [vmem:[%s3429_s27] sm:$0x1] %v2171_v18  ;;  %2156 = vst.msk [vmem:[%s610_s18] sm:$0x1] %vm1477_vm4, %v2155_v17 }
 0x9e4   : > { %2835 = shalt.err (!%p2832_p5)
}
 0x9e5   : > { %s2836_s25 = scalar_lea.hbm %s3462_s20, 16  ;;  %s2840_s24 = scalar_lea.hbm %s3523_s12, 32 }
 0x9e6   : > { %p2837_p6 = scmp.ne.s32.totalorder %s3462_s20, %s2836_s25  ;;  %p2841_p10 = scmp.lt.u32.totalorder %s3462_s20, %s3523_s12 }
 0x9e7   : > { %p2842_p11 = scmp.lt.u32.totalorder %s2840_s24, %s2836_s25  ;;  %p2844_p13 = scmp.lt.u32.totalorder %s2836_s25, %s3462_s20 }
 0x9e8   : > { %p2838_p7 = pnand %p2837_p6, %p3024_p4 }
 0x9e9   : > { %p2843_p12 = por %p2842_p11, %p2841_p10 }
 0x9ea   : > { %p2839_p9 = pneg %p2838_p7 }
 0x9eb   : > { %p2845_p0 = por %p2844_p13, %p2843_p12 }
 0x9ed   : > { %p2846_p1 = pnand %p2845_p0, %p2839_p9 }
 0x9ef   : > { %2849 = shalt.err (!%p2846_p1)
}
 0x9f0   : > { %2671 = dma.vmem_to_hbm [thread:$0]  (%p3024_p4), %s3464_s19, 16, %s3462_s20, %s2174_s16  }
 0x9f1 PF: > { %s3544_s26 = sld [smem:[#allocation12_spill]]  ;;  %s3545_s28 = sld [smem:[#allocation9_spill]] }
 0x9f7   : > { %p2677_p2 = scmp.ge.s32.totalorder %s3544_s26, 2  ;;  %s2210_s22 = sand.u32 1, %s3545_s28  }
 0x9f8   : > { %s2211_s17 = scalar_lea.sflag [#allocation7], %s2210_s22 }
 0x9f9   : > { %p2674_p3 = pnand %p2677_p2, %p3031_p8 }
 0x9fb   : > { %2875 = dma.done.wait (!%p2674_p3), %s2211_s17, 16  }
 0x9fc   : > { %2877 = vsyncadd (!%p2674_p3), %s2211_s17, 4294967280  ;;  %s28_s18 = sadd.s32 1, %s3544_s26   ;;  %s3547_s3 = sld [smem:[#allocation10_spill]] }
 0x9fd   : > { %p25_p5 = scmp.ge.s32.totalorder %s28_s18, 4   ;;  %s3548_s15 = sld [smem:[#allocation15_spill]] }
 0x9fe   : > { %s3549_s16 = sld [smem:[#allocation11_spill]]  ;;  %s3550_s17 = sld [smem:[#allocation13_spill]] }
 0x9ff   : > { %s3551_s29 = smov %s2884_s30  ;;  %27 = sbr.rel (!%p25_p5) target bundleno = 6 (0x6), region = 162 }
 0xa02   : > { %s3552_s30 = smov %s3547_s3 }
 0xa06   :  { %2227 = vsyncpa [#allocation7], 1 }
 0xa07   :  { %2229 = vsyncpa [#allocation7 + $0x1], 1 }

</bundles_post_ra>
